<compile_context>
chip_gen: v7x
topology: tpu7x:2x2x1
jax: 0.10.0
libtpu: 0.0.40
codegen_flags: <defaults>
</compile_context>

<pallas_src>
import math
from functools import partial

import jax
import jax.numpy as jnp
from jax import lax
from jax.experimental import pallas as pl
from jax.experimental.pallas import tpu as pltpu

SELU_ALPHA = 1.6732632423543772
SELU_SCALE = 1.0507009873554805
C_PAD = 128                       # lane-dense community axis
Y_RESIDENT_CAP = 8 << 20          # keep y fully VMEM-resident while (2 buffers) <= 8 MiB
VMEM_BUDGET = 36 << 20            # conservative per-call budget (v7x: 64 MiB physical VMEM)


def _round_up(x, m):
    return ((x + m - 1) // m) * m


def _round_down(x, m):
    return max(m, (x // m) * m)


def _main_vmem_bytes(tm, tk, nk, y_resident):
    a = 2 * tm * tk * 2                                       # bf16 A double-buffer
    y = (2 * nk * C_PAD * 2) if y_resident else (2 * tk * C_PAD * 2)
    d = 2 * tm * 4
    skip = 2 * tm * C_PAD * 4
    out = 2 * tm * C_PAD * 4
    acc = tm * C_PAD * 4
    return a + y + d + skip + out + acc


def _prepass_vmem_bytes(tm, tk, a_itemsize):
    a_in = 2 * tm * tk * a_itemsize                           # A double-buffer (input dtype)
    a_out = 2 * tm * tk * 2                                   # bf16 copy double-buffer
    d = 2 * tm * 4
    deg = tm * 4
    return a_in + a_out + d + deg


def _choose_tiles(N, tm, tk, a_itemsize):
    # defensive (8, 128) alignment of user-supplied tile sizes
    tm = _round_down(tm, 8)
    tk = _round_down(tk, 128)
    # never exceed the (padded) problem size
    tm = min(tm, _round_up(N, 8))
    tk = min(tk, _round_up(N, 128))
    # v7x megacore: make sure the "parallel" row axis has >= 2 tiles so both TCs get work
    if _round_up(N, tm) // tm < 2 and N > 8:
        tm = min(tm, _round_up(-(-N // 2), 8))

    def need(tm_, tk_):
        nk = _round_up(N, tk_)
        y_res = 2 * nk * C_PAD * 2 <= Y_RESIDENT_CAP
        return max(_main_vmem_bytes(tm_, tk_, nk, y_res),
                   _prepass_vmem_bytes(tm_, tk_, a_itemsize))

    # shrink tiles until both passes fit the VMEM budget (v7x has the least headroom)
    while need(tm, tk) > VMEM_BUDGET and tk > 512:
        tk = _round_down(tk // 2, 128)
    while need(tm, tk) > VMEM_BUDGET and tm > 256:
        tm = _round_down(tm // 2, 8)
    return tm, tk


@partial(jax.jit, static_argnames=("tm", "tk"))
def gcn_cluster_forward(x0, A, w_gcn_t, b_gcn, w_skip_t, *, tm=1024, tk=2048):
    """x0:(N,F), A:(N,N) f32 or bf16, w_gcn_t/w_skip_t:(F,C) transposed weights, b_gcn:(1,C)."""
    N, F = x0.shape
    C = w_gcn_t.shape[1]
    a_itemsize = jnp.dtype(A.dtype).itemsize

    tm, tk = _choose_tiles(N, tm, tk, a_itemsize)
    Nm = _round_up(N, tm)
    Nk = _round_up(N, tk)
    grid = (Nm // tm, Nk // tk)
    y_resident = 2 * Nk * C_PAD * 2 <= Y_RESIDENT_CAP
    aligned = (N == Nm) and (N == Nk)

    # ---------------- pass 1: fused degree + bf16 cast + pad of A (single stream) -------
    def prepass_kernel(a_ref, abf_ref, d_ref, deg_ref):
        k = pl.program_id(1)

        @pl.when(k == 0)
        def _():
            deg_ref[...] = jnp.zeros_like(deg_ref)

        a = a_ref[...].astype(jnp.float32)
        if not aligned:
            i = pl.program_id(0)
            row = i * tm + lax.broadcasted_iota(jnp.int32, (tm, 1), 0)
            col = k * tk + lax.broadcasted_iota(jnp.int32, (1, tk), 1)
            a = jnp.where((row < N) & (col < N), a, 0.0)
        abf_ref[...] = a.astype(jnp.bfloat16)
        deg_ref[...] += jnp.sum(a, axis=1, keepdims=True)

        @pl.when(k == pl.num_programs(1) - 1)
        def _():
            deg = deg_ref[...]
            # guard isolated nodes: reference produces inf/NaN there, we deliberately emit 0
            d_ref[...] = jnp.where(deg > 0.0,
                                   lax.rsqrt(jnp.maximum(deg, 1e-30)), 0.0)

    a_bf16, d_col = pl.pallas_call(
        prepass_kernel,
        out_shape=(jax.ShapeDtypeStruct((Nm, Nk), jnp.bfloat16),
                   jax.ShapeDtypeStruct((Nm, 1), jnp.float32)),
        grid_spec=pltpu.PrefetchScalarGridSpec(
            num_scalar_prefetch=0,
            grid=grid,
            in_specs=[pl.BlockSpec((tm, tk), lambda i, k: (i, k))],
            out_specs=(pl.BlockSpec((tm, tk), lambda i, k: (i, k)),
                       pl.BlockSpec((tm, 1), lambda i, k: (i, 0))),
            scratch_shapes=[pltpu.VMEM((tm, 1), jnp.float32)],
        ),
        compiler_params=pltpu.CompilerParams(
            dimension_semantics=("parallel", "arbitrary"),
            vmem_limit_bytes=_prepass_vmem_bytes(tm, tk, a_itemsize) + (8 << 20)),
    )(A)

    # ---------------- cheap XLA projections (O(N*F + N*C_PAD) work) ---------------------
    wg = jnp.pad(w_gcn_t.astype(jnp.float32), ((0, 0), (0, C_PAD - C)))
    ws = jnp.pad(w_skip_t.astype(jnp.float32), ((0, 0), (0, C_PAD - C)))
    bg = jnp.pad(b_gcn.astype(jnp.float32), ((0, 0), (0, C_PAD - C)))

    d_n = d_col[:N]
    y = jnp.dot(d_n * x0.astype(jnp.float32), wg, preferred_element_type=jnp.float32)
    skip = jnp.dot(x0.astype(jnp.float32), ws, preferred_element_type=jnp.float32) + bg

    y_p = jnp.pad(y.astype(jnp.bfloat16), ((0, Nk - N), (0, 0)))       # (Nk, C_PAD) bf16
    s_p = jnp.pad(skip, ((0, Nm - N), (0, 0)))                          # (Nm, C_PAD) f32

    # ---------------- pass 2: K-tiled A @ y + degree scale + skip + SELU + softmax ------
    def kernel(a_ref, y_ref, d_ref, skip_ref, out_ref, acc_ref):
        k = pl.program_id(1)

        @pl.when(k == 0)
        def _():
            acc_ref[...] = jnp.zeros_like(acc_ref)

        if y_resident:
            # y lives fully in VMEM (loaded once); slice the K block in-kernel
            y_blk = y_ref[pl.ds(pl.multiple_of(k * tk, 128), tk), :]
        else:
            y_blk = y_ref[...]
        # bf16 x bf16 -> f32 accumulate on the MXU
        acc_ref[...] += jnp.dot(a_ref[...], y_blk, preferred_element_type=jnp.float32)

        @pl.when(k == pl.num_programs(1) - 1)
        def _():
            h = d_ref[...] * acc_ref[...] + skip_ref[...]               # (tm, C_PAD) f32
            # SELU (f32 elementwise; exp on the positive branch is selected away)
            h = SELU_SCALE * jnp.where(h > 0, h, SELU_ALPHA * (jnp.exp(h) - 1.0))
            # TODO(synk): nn.Dropout is identity in eval mode; training-mode dropout omitted.
            # mask padded community columns out of the softmax
            col = lax.broadcasted_iota(jnp.int32, h.shape, 1)
            h = jnp.where(col < C, h, -jnp.inf)
            m = jnp.max(h, axis=1, keepdims=True)
            e = jnp.exp(h - m)
            # exact normalization (finalize runs once per row tile, so it's free)
            out_ref[...] = (e / jnp.sum(e, axis=1, keepdims=True)).astype(out_ref.dtype)

    y_spec = (pl.BlockSpec((Nk, C_PAD), lambda i, k: (0, 0)) if y_resident
              else pl.BlockSpec((tk, C_PAD), lambda i, k: (k, 0)))

    out_p = pl.pallas_call(
        kernel,
        out_shape=jax.ShapeDtypeStruct((Nm, C_PAD), jnp.float32),
        grid_spec=pltpu.PrefetchScalarGridSpec(
            num_scalar_prefetch=0,
            grid=grid,
            in_specs=[
                pl.BlockSpec((tm, tk), lambda i, k: (i, k)),       # A tile (bf16)
                y_spec,                                            # y (bf16)
                pl.BlockSpec((tm, 1), lambda i, k: (i, 0)),        # d (f32)
                pl.BlockSpec((tm, C_PAD), lambda i, k: (i, 0)),    # skip + bias (f32)
            ],
            out_specs=pl.BlockSpec((tm, C_PAD), lambda i, k: (i, 0)),
            scratch_shapes=[pltpu.VMEM((tm, C_PAD), jnp.float32)],
        ),
        compiler_params=pltpu.CompilerParams(
            dimension_semantics=("parallel", "arbitrary"),
            vmem_limit_bytes=_main_vmem_bytes(tm, tk, Nk, y_resident) + (8 << 20)),
    )(a_bf16, y_p, d_col, s_p)

    return out_p[:N, :C]


# TODO(synk): the layers>1 branch (gcn2/skip2 + second propagation) is not implemented;
# the module default (layers=1) is covered.


def xavier_uniform(key, fan_in, fan_out):
    # torch nn.init.xavier_uniform_ on weight of shape (fan_out, fan_in), stored transposed
    bound = math.sqrt(6.0 / (fan_in + fan_out))
    return jax.random.uniform(key, (fan_in, fan_out), jnp.float32, -bound, bound)


def reference_forward(x0, A, w_gcn_t, b_gcn, w_skip_t):
    deg = jnp.sum(A, axis=1)
    d = jnp.diag(deg ** -0.5)
    tilde_A = d @ A @ d
    x = tilde_A @ x0
    h = x @ w_gcn_t + b_gcn + x0 @ w_skip_t
    h = SELU_SCALE * jnp.where(h > 0, h, SELU_ALPHA * (jnp.exp(h) - 1.0))
    return jax.nn.softmax(h, axis=1)


if __name__ == "__main__":
    # N nodes, node_feature_dim F, num_communities C (layers=1)
    N, F, C = 256, 32, 8

    key = jax.random.PRNGKey(0)
    k_x, k_a, k_wg, k_bg, k_ws = jax.random.split(key, 5)

    x0 = jax.random.normal(k_x, (N, F), jnp.float32)
    # strictly positive adjacency so row-degree ** -0.5 matches the reference exactly
    A = jax.random.uniform(k_a, (N, N), jnp.float32, 0.1, 1.0)

    w_gcn_t = xavier_uniform(k_wg, F, C)                        # (F, C) transposed
    bb = 1.0 / math.sqrt(F)                                     # torch Linear default bias init
    b_gcn = jax.random.uniform(k_bg, (1, C), jnp.float32, -bb, bb)
    w_skip_t = xavier_uniform(k_ws, F, C)                       # (F, C) transposed, no bias

    ref = reference_forward(x0, A, w_gcn_t, b_gcn, w_skip_t)

    ok = True
    # config 1: explicit small tiles -> grid (2, 2), exercises the pipelined accumulator
    # and the resident-y dynamic slice path.  config 2: default (auto-chosen) tiles.
    for kwargs in ({"tm": 128, "tk": 128}, {}):
        out = gcn_cluster_forward(x0, A, w_gcn_t, b_gcn, w_skip_t, **kwargs)
        out = jax.block_until_ready(out)

        assert out.shape == (N, C)
        assert bool(jnp.all(jnp.isfinite(out)))
        # A / y are streamed in bf16, so compare against the f32 reference with a relaxed
        # tolerance; normalization is exact so rows sum to 1 to f32 precision.
        max_diff = float(jnp.max(jnp.abs(out - ref)))
        assert jnp.allclose(out, ref, atol=1e-2, rtol=1e-2), \
            f"mismatch vs reference ({kwargs}), max abs diff={max_diff}"
        assert jnp.allclose(jnp.sum(out, axis=1), 1.0, atol=1e-4), \
            "softmax rows must sum to ~1"
        ok = ok and True

    if ok:
        print("KERNEL_OK")
</pallas_src>

<mosaic_0001>
module attributes {stable_mosaic.version = 11 : i64} {
  func.func @prepass_kernel(%arg0: i32, %arg1: i32, %arg2: memref<128x128xf32, #tpu.memory_space<vmem>>, %arg3: memref<128x128xbf16, #tpu.memory_space<vmem>>, %arg4: memref<128x1xf32, #tpu.memory_space<vmem>>, %arg5: memref<128x1xf32, #tpu.memory_space<vmem>>) attributes {dimension_semantics = [#tpu.dimension_semantics<parallel>, #tpu.dimension_semantics<arbitrary>], iteration_bounds = array<i64: 2, 2>, scalar_prefetch = 0 : i64, scratch_operands = 1 : i64, tpu.core_type = #tpu.core_type<tc>, window_params = [{transform_indices = @transform_0, window_bounds = array<i64: 128, 128>}, {transform_indices = @transform_1, window_bounds = array<i64: 128, 128>}, {transform_indices = @transform_2, window_bounds = array<i64: 128, 1>}]} {
    %c0_i32 = arith.constant 0 : i32
    %0 = arith.cmpi eq, %arg1, %c0_i32 : i32
    %1 = arith.extui %0 : i1 to i32
    %c0_i32_0 = arith.constant 0 : i32
    %2 = arith.cmpi ne, %1, %c0_i32_0 : i32
    scf.if %2 {
      %cst_9 = arith.constant 0.000000e+00 : f32
      %14 = vector.broadcast %cst_9 : f32 to vector<128x1xf32>
      %c0_10 = arith.constant 0 : index
      %c0_11 = arith.constant 0 : index
      %15 = vector.load %arg5[%c0_10, %c0_11] : memref<128x1xf32, #tpu.memory_space<vmem>>, vector<128x1xf32>
      tpu.vector_store %arg5[%c0_10, %c0_11], %14 {strides = array<i32>} : memref<128x1xf32, #tpu.memory_space<vmem>>, vector<128x1xf32>,
    } else {
    }
    %c0 = arith.constant 0 : index
    %c0_1 = arith.constant 0 : index
    %3 = vector.load %arg2[%c0, %c0_1] : memref<128x128xf32, #tpu.memory_space<vmem>>, vector<128x128xf32>
    %4 = arith.truncf %3 : vector<128x128xf32> to vector<128x128xbf16>
    %c0_2 = arith.constant 0 : index
    %c0_3 = arith.constant 0 : index
    %5 = vector.load %arg3[%c0_2, %c0_3] : memref<128x128xbf16, #tpu.memory_space<vmem>>, vector<128x128xbf16>
    tpu.vector_store %arg3[%c0_2, %c0_3], %4 {strides = array<i32>} : memref<128x128xbf16, #tpu.memory_space<vmem>>, vector<128x128xbf16>,
    %c0_4 = arith.constant 0 : index
    %c0_5 = arith.constant 0 : index
    %6 = vector.load %arg5[%c0_4, %c0_5] : memref<128x1xf32, #tpu.memory_space<vmem>>, vector<128x1xf32>
    %cst = arith.constant dense<0.000000e+00> : vector<128xf32>
    %7 = vector.multi_reduction <add>, %3, %cst [1] : vector<128x128xf32> to vector<128xf32>
    %8 = vector.shape_cast %7 : vector<128xf32> to vector<128x1xf32>
    %9 = arith.addf %6, %8 : vector<128x1xf32>
    %c0_6 = arith.constant 0 : index
    %c0_7 = arith.constant 0 : index
    %10 = vector.load %arg5[%c0_6, %c0_7] : memref<128x1xf32, #tpu.memory_space<vmem>>, vector<128x1xf32>
    tpu.vector_store %arg5[%c0_6, %c0_7], %9 {strides = array<i32>} : memref<128x1xf32, #tpu.memory_space<vmem>>, vector<128x1xf32>,
    %c1_i32 = arith.constant 1 : i32
    %11 = arith.cmpi eq, %arg1, %c1_i32 : i32
    %12 = arith.extui %11 : i1 to i32
    %c0_i32_8 = arith.constant 0 : i32
    %13 = arith.cmpi ne, %12, %c0_i32_8 : i32
    scf.if %13 {
      %c0_9 = arith.constant 0 : index
      %c0_10 = arith.constant 0 : index
      %14 = vector.load %arg5[%c0_9, %c0_10] : memref<128x1xf32, #tpu.memory_space<vmem>>, vector<128x1xf32>
      %cst_11 = arith.constant 0.000000e+00 : f32
      %15 = vector.broadcast %cst_11 : f32 to vector<128x1xf32>
      %16 = arith.cmpf ogt, %14, %15 : vector<128x1xf32>
      %cst_12 = arith.constant 1.000000e-30 : f32
      %17 = vector.broadcast %cst_12 : f32 to vector<128x1xf32>
      %18 = arith.maximumf %14, %17 : vector<128x1xf32>
      %19 = math.rsqrt %18 : vector<128x1xf32>
      %cst_13 = arith.constant 0.000000e+00 : f32
      %20 = vector.broadcast %cst_13 : f32 to vector<128x1xf32>
      %21 = arith.select %16, %19, %20 : vector<128x1xi1>, vector<128x1xf32>
      %c0_14 = arith.constant 0 : index
      %c0_15 = arith.constant 0 : index
      %22 = vector.load %arg4[%c0_14, %c0_15] : memref<128x1xf32, #tpu.memory_space<vmem>>, vector<128x1xf32>
      tpu.vector_store %arg4[%c0_14, %c0_15], %21 {strides = array<i32>} : memref<128x1xf32, #tpu.memory_space<vmem>>, vector<128x1xf32>,
    } else {
    }
    return
  }
  func.func @transform_0(%arg0: i32, %arg1: i32) -> (i32, i32) {
    %c0_i32 = arith.constant 0 : i32
    return %arg0, %arg1 : i32, i32
  }
  func.func @transform_1(%arg0: i32, %arg1: i32) -> (i32, i32) {
    %c0_i32 = arith.constant 0 : i32
    return %arg0, %arg1 : i32, i32
  }
  func.func @transform_2(%arg0: i32, %arg1: i32) -> (i32, i32) {
    %c0_i32 = arith.constant 0 : i32
    %c0_i32_0 = arith.constant 0 : i32
    return %arg0, %c0_i32 : i32, i32
  }
}

module attributes {stable_mosaic.version = 11 : i64} {
  func.func @kernel(%arg0: i32, %arg1: i32, %arg2: memref<128x128xbf16, #tpu.memory_space<vmem>>, %arg3: memref<256x128xbf16, #tpu.memory_space<vmem>>, %arg4: memref<128x1xf32, #tpu.memory_space<vmem>>, %arg5: memref<128x128xf32, #tpu.memory_space<vmem>>, %arg6: memref<128x128xf32, #tpu.memory_space<vmem>>, %arg7: memref<128x128xf32, #tpu.memory_space<vmem>>) attributes {dimension_semantics = [#tpu.dimension_semantics<parallel>, #tpu.dimension_semantics<arbitrary>], iteration_bounds = array<i64: 2, 2>, scalar_prefetch = 0 : i64, scratch_operands = 1 : i64, tpu.core_type = #tpu.core_type<tc>, window_params = [{transform_indices = @transform_0, window_bounds = array<i64: 128, 128>}, {pipeline_mode = #tpu.pipeline_mode<synchronous>, transform_indices = @transform_1, window_bounds = array<i64: 256, 128>}, {transform_indices = @transform_2, window_bounds = array<i64: 128, 1>}, {transform_indices = @transform_3, window_bounds = array<i64: 128, 128>}, {transform_indices = @transform_4, window_bounds = array<i64: 128, 128>}]} {
    %c0_i32 = arith.constant 0 : i32
    %0 = arith.cmpi eq, %arg1, %c0_i32 : i32
    %1 = arith.extui %0 : i1 to i32
    %c0_i32_0 = arith.constant 0 : i32
    %2 = arith.cmpi ne, %1, %c0_i32_0 : i32
    scf.if %2 {
      %cst_8 = arith.constant 0.000000e+00 : f32
      %15 = vector.broadcast %cst_8 : f32 to vector<128x128xf32>
      %c0_9 = arith.constant 0 : index
      %c0_10 = arith.constant 0 : index
      %16 = vector.load %arg7[%c0_9, %c0_10] : memref<128x128xf32, #tpu.memory_space<vmem>>, vector<128x128xf32>
      tpu.vector_store %arg7[%c0_9, %c0_10], %15 {strides = array<i32>} : memref<128x128xf32, #tpu.memory_space<vmem>>, vector<128x128xf32>,
    } else {
    }
    %c128_i32 = arith.constant 128 : i32
    %3 = arith.muli %arg1, %c128_i32 : i32
    %4 = tpu.assume_multiple %3, 128 : i32
    %5 = arith.index_cast %4 : i32 to index
    %c0 = arith.constant 0 : index
    %6 = vector.load %arg3[%5, %c0] : memref<256x128xbf16, #tpu.memory_space<vmem>>, vector<128x128xbf16>
    %c0_1 = arith.constant 0 : index
    %c0_2 = arith.constant 0 : index
    %7 = vector.load %arg7[%c0_1, %c0_2] : memref<128x128xf32, #tpu.memory_space<vmem>>, vector<128x128xf32>
    %c0_3 = arith.constant 0 : index
    %c0_4 = arith.constant 0 : index
    %8 = vector.load %arg2[%c0_3, %c0_4] : memref<128x128xbf16, #tpu.memory_space<vmem>>, vector<128x128xbf16>
    %cst = arith.constant dense<0.000000e+00> : vector<128x128xf32>
    %9 = tpu.matmul %8, %6, %cst {dimension_numbers = #tpu.dot_dimension_numbers<[1], [0], [0], [1], [0, 0, 1, 1], [], []>} : vector<128x128xbf16>, vector<128x128xbf16>, vector<128x128xf32> -> vector<128x128xf32>
    %10 = arith.addf %7, %9 : vector<128x128xf32>
    %c0_5 = arith.constant 0 : index
    %c0_6 = arith.constant 0 : index
    %11 = vector.load %arg7[%c0_5, %c0_6] : memref<128x128xf32, #tpu.memory_space<vmem>>, vector<128x128xf32>
    tpu.vector_store %arg7[%c0_5, %c0_6], %10 {strides = array<i32>} : memref<128x128xf32, #tpu.memory_space<vmem>>, vector<128x128xf32>,
    %c1_i32 = arith.constant 1 : i32
    %12 = arith.cmpi eq, %arg1, %c1_i32 : i32
    %13 = arith.extui %12 : i1 to i32
    %c0_i32_7 = arith.constant 0 : i32
    %14 = arith.cmpi ne, %13, %c0_i32_7 : i32
    scf.if %14 {
      %c0_8 = arith.constant 0 : index
      %c0_9 = arith.constant 0 : index
      %15 = vector.load %arg4[%c0_8, %c0_9] : memref<128x1xf32, #tpu.memory_space<vmem>>, vector<128x1xf32>
      %c0_10 = arith.constant 0 : index
      %c0_11 = arith.constant 0 : index
      %16 = vector.load %arg7[%c0_10, %c0_11] : memref<128x128xf32, #tpu.memory_space<vmem>>, vector<128x128xf32>
      %17 = vector.broadcast %15 : vector<128x1xf32> to vector<128x128xf32>
      %18 = arith.mulf %17, %16 : vector<128x128xf32>
      %c0_12 = arith.constant 0 : index
      %c0_13 = arith.constant 0 : index
      %19 = vector.load %arg5[%c0_12, %c0_13] : memref<128x128xf32, #tpu.memory_space<vmem>>, vector<128x128xf32>
      %20 = arith.addf %18, %19 : vector<128x128xf32>
      %cst_14 = arith.constant 0.000000e+00 : f32
      %21 = vector.broadcast %cst_14 : f32 to vector<128x128xf32>
      %22 = arith.cmpf ogt, %20, %21 : vector<128x128xf32>
      %23 = math.exp %20 : vector<128x128xf32>
      %cst_15 = arith.constant 1.000000e+00 : f32
      %24 = vector.broadcast %cst_15 : f32 to vector<128x128xf32>
      %25 = arith.subf %23, %24 : vector<128x128xf32>
      %cst_16 = arith.constant 1.67326319 : f32
      %26 = vector.broadcast %cst_16 : f32 to vector<128x128xf32>
      %27 = arith.mulf %26, %25 : vector<128x128xf32>
      %28 = arith.select %22, %20, %27 : vector<128x128xi1>, vector<128x128xf32>
      %cst_17 = arith.constant 1.05070102 : f32
      %29 = vector.broadcast %cst_17 : f32 to vector<128x128xf32>
      %30 = arith.mulf %29, %28 : vector<128x128xf32>
      %31 = tpu.iota {dimensions = array<i32: 1>} : vector<128x128xi32>
      %c8_i32 = arith.constant 8 : i32
      %32 = vector.broadcast %c8_i32 : i32 to vector<128x128xi32>
      %33 = arith.cmpi slt, %31, %32 : vector<128x128xi32>
      %cst_18 = arith.constant 0xFF800000 : f32
      %34 = vector.broadcast %cst_18 : f32 to vector<128x128xf32>
      %35 = arith.select %33, %30, %34 : vector<128x128xi1>, vector<128x128xf32>
      %cst_19 = arith.constant dense<0xFF800000> : vector<128xf32>
      %36 = vector.multi_reduction <maximumf>, %35, %cst_19 [1] : vector<128x128xf32> to vector<128xf32>
      %37 = vector.shape_cast %36 : vector<128xf32> to vector<128x1xf32>
      %38 = vector.broadcast %37 : vector<128x1xf32> to vector<128x128xf32>
      %39 = arith.subf %35, %38 : vector<128x128xf32>
      %40 = math.exp %39 : vector<128x128xf32>
      %cst_20 = arith.constant dense<0.000000e+00> : vector<128xf32>
      %41 = vector.multi_reduction <add>, %40, %cst_20 [1] : vector<128x128xf32> to vector<128xf32>
      %42 = vector.shape_cast %41 : vector<128xf32> to vector<128x1xf32>
      %43 = vector.broadcast %42 : vector<128x1xf32> to vector<128x128xf32>
      %44 = arith.divf %40, %43 : vector<128x128xf32>
      %c0_21 = arith.constant 0 : index
      %c0_22 = arith.constant 0 : index
      %45 = vector.load %arg6[%c0_21, %c0_22] : memref<128x128xf32, #tpu.memory_space<vmem>>, vector<128x128xf32>
      tpu.vector_store %arg6[%c0_21, %c0_22], %44 {strides = array<i32>} : memref<128x128xf32, #tpu.memory_space<vmem>>, vector<128x128xf32>,
    } else {
    }
    return
  }
  func.func @transform_0(%arg0: i32, %arg1: i32) -> (i32, i32) {
    %c0_i32 = arith.constant 0 : i32
    return %arg0, %arg1 : i32, i32
  }
  func.func @transform_1(%arg0: i32, %arg1: i32) -> (i32, i32) {
    %c0_i32 = arith.constant 0 : i32
    %c0_i32_0 = arith.constant 0 : i32
    %c0_i32_1 = arith.constant 0 : i32
    return %c0_i32, %c0_i32_0 : i32, i32
  }
  func.func @transform_2(%arg0: i32, %arg1: i32) -> (i32, i32) {
    %c0_i32 = arith.constant 0 : i32
    %c0_i32_0 = arith.constant 0 : i32
    return %arg0, %c0_i32 : i32, i32
  }
  func.func @transform_3(%arg0: i32, %arg1: i32) -> (i32, i32) {
    %c0_i32 = arith.constant 0 : i32
    %c0_i32_0 = arith.constant 0 : i32
    return %arg0, %c0_i32 : i32, i32
  }
  func.func @transform_4(%arg0: i32, %arg1: i32) -> (i32, i32) {
    %c0_i32 = arith.constant 0 : i32
    %c0_i32_0 = arith.constant 0 : i32
    return %arg0, %c0_i32 : i32, i32
  }
}

</mosaic_0001>

<bundles_post_ra>
// kernel: gcn_cluster_forward.2
= control target key start
LH: loop header
LB: loop body
LE: loop exit
PB: predicated region body
PF: predicated region fallthrough
CT: control target
= control target key end

     0   :  { %8 = vsyncpa [#allocation4], 0  ;;  %s1360_s0 = inlined_call_operand.hbm [shape: f32[256,256], index: 0, kind: input, shape index: {}]   ;;  %s1361_s1 = inlined_call_operand.vmem [shape: bf16[256,256], index: 1, kind: output, shape index: {0}]   ;;  %s1362_s2 = inlined_call_operand.vmem [shape: f32[256,1], index: 2, kind: output, shape index: {1}]  }
   0x1   :  { %10 = vsyncpa [#allocation4 + $0x1], 0  ;;  %s1039_s9 = smov 0   ;;  %s1041_s10 = smov 0  }
   0x2   :  { %s1043_s11 = smov 0   ;;  %s1045_s12 = smov 0  }
   0x3   :  { %s1047_s13 = smov 0   ;;  %s1049_s14 = smov 0  }
   0x4   :  { %s1051_s15 = smov 0   ;;  %s1053_s16 = smov 0  }
   0x5 LB: > { %s712_s17 = sadd.s32 4294967295, %s1017_s16   ;;  %s25_s18 = sadd.s32 1, %s1009_s14  ;;  %s1017_s16 = sphi %s1053_s16, %s16_s16   ;;  %s1013_s15 = sphi %s1051_s15, %s1375_s15   ;;  %s1009_s14 = sphi %s1049_s14, %s1374_s14   ;;  %s1005_s13 = sphi %s1047_s13, %s1373_s13   ;;  %s1001_s12 = sphi %s1045_s12, %s1372_s12   ;;  %s997_s11 = sphi %s1043_s11, %s1371_s11   ;;  %s993_s10 = sphi %s1041_s10, %s1370_s10   ;;  %s989_s9 = sphi %s1039_s9, %s1369_s9  }
   0x6   : > { %p26_p0 = scmp.ge.s32.totalorder %s25_s18, 2  ;;  %s28_s19 = sadd.s32 1, %s1013_s15 }
   0x7   : > { %s37_s20 = sadd.s32 1, %s997_s11  ;;  %p44_p1 = scmp.ne.s32.totalorder %s997_s11, %s993_s10 }
   0x8   : > { %s1377_s18 = smov (%p26_p0, %s25_s18), 0  ;;  %s1379_s19 = smov (!%p26_p0, %s28_s19), %s1013_s15 }
   0x9   : > { %s33_s21 = ssub.s32 %s1009_s14, %s1377_s18  ;;  %p45_p2 = scmp.eq.s32.totalorder %s1017_s16, 0 }
   0xa   : > { %p30_p3 = scmp.ge.s32.totalorder %s1379_s19, 2  ;;  %p50_p4 = scmp.ne.s32.totalorder %s993_s10, %s989_s9 }
   0xb   : > { %p1093_p5 = por %p45_p2, %p44_p1  ;;  %p51_p6 = scmp.eq.s32.totalorder %s712_s17, 0 }
   0xc   : > { %s1381_s19 = smov (%p30_p3, %s1379_s19), 0  ;;  %p76_p8 = scmp.eq.s32.totalorder %s712_s17, 3 }
   0xd   : > { %p1099_p7 = por %p51_p6, %p50_p4  ;;  %s32_s24 = ssub.s32 %s1013_s15, %s1381_s19 }
   0xe   : > { %s34_s25 = sor.u32 %s33_s21, %s32_s24  ;;  %p1108_p9 = por %p76_p8, %p44_p1 }
   0xf   : > { %p35_p10 = scmp.eq.s32.totalorder %s34_s25, 0  ;;  %p820_p11 = scmp.lt.s32.totalorder %s1017_s16, 4 }
  0x10   : > { %s1365_s26 = scalar_select %p1108_p9, 1, 0 }
  0x11   : > { %s128_s27 = sand.u32 1, %s997_s11   ;;  %s749_s28 = sshll.u32 %s1013_s15, 5 }
  0x12   : > { %s1116_s29 = scalar_select %p35_p10, %s997_s11, %s37_s20  }
  0x13   : > { %s716_s30 = sshll.u32 %s128_s27, 7  ;;  %s138_s3 = sadd.s32 %s1009_s14, %s749_s28 }
  0x14   : > { %s719_s4 = sshll.u32 %s138_s3, 7  ;;  %s132_s5 = scalar_lea.vmem [#allocation3], %s716_s30 }
  0x15   : > { %s141_s6 = sshll.u32 %s132_s5, 4  ;;  %s1122_s9 = scalar_lea.hbm %s1360_s0, %s719_s4  ;;  %s1124_s6 = int_to_ptr.vmem [resolvable:$true] %s141_s6 }
  0x16   : > { %p1128_p12 = pnand %p820_p11, %p1093_p5  ;;  %s1133_s20 = scalar_lea.sflag [#allocation4], %s128_s27 }
  0x17   : > { %s921_s21 = scalar_lea.hbm %s1122_s9, 2048  ;;  %s926_s22 = scalar_lea.hbm %s1360_s0, 8192 }
  0x18   : > { %p922_p0 = scmp.ne.s32.totalorder %s1122_s9, %s921_s21  ;;  %p923_p1 = pneg %p1128_p12 }
  0x19   : > { %p927_p4 = scmp.lt.u32.totalorder %s1122_s9, %s1360_s0  ;;  %p928_p5 = scmp.lt.u32.totalorder %s926_s22, %s921_s21 }
  0x1a   : > { %p924_p2 = pnand %p923_p1, %p922_p0  ;;  %p930_p8 = scmp.lt.u32.totalorder %s921_s21, %s1122_s9 }
  0x1b   : > { %p929_p6 = por %p928_p5, %p927_p4 }
  0x1c   : > { %p925_p3 = pneg %p924_p2 }
  0x1d   : > { %p931_p10 = por %p930_p8, %p929_p6 }
  0x1f   : > { %p932_p11 = pnand %p931_p10, %p925_p3 }
  0x21   : > { %935 = shalt.err (!%p932_p11)
}
  0x22   : > { %s936_s27 = scalar_lea.vmem %s1124_s6, 2048  ;;  %s1019_s3 = smov [#allocation3]  }
  0x23   : > { %p937_p0 = scmp.ne.s32.totalorder %s1124_s6, %s936_s27  ;;  %s941_s4 = sshll.u32 %s1019_s3, 4  ;;  %s942_s4 = int_to_ptr.vmem [resolvable:$false] %s941_s4 }
  0x24   : > { %s943_s5 = scalar_lea.vmem %s942_s4, 4096  ;;  %p944_p9 = scmp.lt.s32.totalorder %s1124_s6, %s942_s4 }
  0x25   : > { %p939_p2 = pnand %p937_p0, %p923_p1  ;;  %p945_p4 = scmp.lt.s32.totalorder %s943_s5, %s936_s27 }
  0x27   : > { %p940_p13 = pneg %p939_p2  ;;  %p946_p5 = por %p945_p4, %p944_p9 }
  0x29   : > { %p947_p6 = pnand %p946_p5, %p940_p13 }
  0x2b   : > { %950 = shalt.err (!%p947_p6)
}
  0x2c   : > { %s1020_s7 = smov 256   ;;  %s1021_s8 = smov 128  }
  0x2d   : > { %s1022_s21 = smov 8   ;;  %p149_p1 = scmp.lt.s32.totalorder %s1017_s16, 5 }
  0x2e   : > { %819 = dma.hbm_to_vmem [thread:$0]  (!%p1128_p12), %s1122_s9, 2048, %s1124_s6, %s1133_s20, %s1020_s7, %s1021_s8, %s1022_s21  }
  0x2f   : > { %p1367_p3 = scmp.ge.s32.totalorder %s1017_s16, 1 }
  0x31   : > { %p150_p8 = pnand %p1367_p3, %p149_p1 }
  0x32   : > { %s155_s24 = sand.u32 (!%p150_p8), 1, %s993_s10  }
  0x33   : > { %153 = sbr.rel (%p150_p8) target bundleno = 281 (0x119), region = 24  ;;  %s721_s25 = sshll.u32 (!%p150_p8), %s155_s24, 7 }
  0x34   : > { %s156_s22 = scalar_lea.sflag (!%p150_p8), [#allocation4], %s155_s24  ;;  %s1165_s28 = scalar_lea.vmem (!%p150_p8), [#allocation3], %s721_s25 }
  0x3a   : > { %984 = dma.done.wait (%p1099_p7), %s156_s22, 2048  }
  0x3b   : > { %986 = vsyncadd (%p1099_p7), %s156_s22, 4294965248  ;;  %s722_s30 = sshll.u32 %s155_s24, 6  ;;  %s723_s17 = sshll.u32 %s1005_s13, 4 }
  0x3c   : > { %p187_p9 = scmp.lt.s32.totalorder %s723_s17, 31  ;;  %s1177_s3 = scalar_lea.vmem [#allocation5], %s722_s30 }
  0x3d   : > { %p725_p12 = scmp.ne.s32.totalorder %s1001_s12, 0 }
  0x3e   : > { %s1383_s17 = smov (!%p187_p9, %s723_s17), 31  ;;  %vm196_vm0 = vcmask (!%p725_p12), 7168   ;;  %v1023_v0 = vmov (!%p725_p12), 0.0  }
  0x3f   : > { %s724_s6 = sshll.u32 %s1383_s17, 3  ;;  %195 = sbr.rel (%p725_p12) target bundleno = 71 (0x47), region = 32  ;;  %197 = vst.msk [vmem:[#allocation2] sm:$0xff] (!%p725_p12), %vm196_vm0, %v1023_v0  ;;  %198 = vst.msk [vmem:[#allocation2 + $0x8] sm:$0xff] (!%p725_p12), %vm196_vm0, %v1023_v0 }
  0x40   : > { %s1175_s27 = scalar_lea.vmem %s1362_s2, %s724_s6  ;;  %199 = vst.msk [vmem:[#allocation2 + $0x10] sm:$0xff] (!%p725_p12), %vm196_vm0, %v1023_v0  ;;  %200 = vst.msk [vmem:[#allocation2 + $0x18] sm:$0xff] (!%p725_p12), %vm196_vm0, %v1023_v0 }
  0x41   : > { %201 = vst.msk [vmem:[#allocation2 + $0x20] sm:$0xff] (!%p725_p12), %vm196_vm0, %v1023_v0  ;;  %202 = vst.msk [vmem:[#allocation2 + $0x28] sm:$0xff] (!%p725_p12), %vm196_vm0, %v1023_v0 }
  0x42   : > { %203 = vst.msk [vmem:[#allocation2 + $0x30] sm:$0xff] (!%p725_p12), %vm196_vm0, %v1023_v0  ;;  %204 = vst.msk [vmem:[#allocation2 + $0x38] sm:$0xff] (!%p725_p12), %vm196_vm0, %v1023_v0 }
  0x43   : > { %205 = vst.msk [vmem:[#allocation2 + $0x40] sm:$0xff] (!%p725_p12), %vm196_vm0, %v1023_v0  ;;  %206 = vst.msk [vmem:[#allocation2 + $0x48] sm:$0xff] (!%p725_p12), %vm196_vm0, %v1023_v0 }
  0x44   : > { %207 = vst.msk [vmem:[#allocation2 + $0x50] sm:$0xff] (!%p725_p12), %vm196_vm0, %v1023_v0  ;;  %208 = vst.msk [vmem:[#allocation2 + $0x58] sm:$0xff] (!%p725_p12), %vm196_vm0, %v1023_v0 }
  0x45   : > { %209 = vst.msk [vmem:[#allocation2 + $0x60] sm:$0xff] (!%p725_p12), %vm196_vm0, %v1023_v0  ;;  %210 = vst.msk [vmem:[#allocation2 + $0x68] sm:$0xff] (!%p725_p12), %vm196_vm0, %v1023_v0 }
  0x46   : > { %211 = vst.msk [vmem:[#allocation2 + $0x70] sm:$0xff] %vm196_vm0, %v1023_v0  ;;  %212 = vst.msk [vmem:[#allocation2 + $0x78] sm:$0xff] %vm196_vm0, %v1023_v0 }
  0x47 PF: > { %v215_v1 = vld [vmem:[%s1165_s28 + $0x10] sm:$0xff]  ;;  %v213_v2 = vld [vmem:[%s1165_s28] sm:$0xff]  ;;  %v216_v3 = vld [vmem:[%s1165_s28 + $0x18] sm:$0xff]  ;;  %vm373_vm1 = vcmask 7168   ;;  %p742_p7 = scmp.ne.s32.totalorder %s1001_s12, 1 }
  0x48   : > { %329 = vadd.xlane.f32.xlu1 %v215_v1  ;;  %325 = vadd.xlane.f32.xlu0 %v213_v2  ;;  %v775_v4 = vpack.c.bf16 %v216_v3, %v215_v1  ;;  %v214_v5 = vld [vmem:[%s1165_s28 + $0x8] sm:$0xff]  ;;  %v217_v7 = vld [vmem:[%s1165_s28 + $0x20] sm:$0xff]  ;;  %v220_v10 = vld [vmem:[%s1165_s28 + $0x38] sm:$0xff] }
  0x49   : > { %v218_v6 = vld [vmem:[%s1165_s28 + $0x28] sm:$0xff]  ;;  %v770_v8 = vpack.c.bf16 %v214_v5, %v213_v2  ;;  %v219_v11 = vld [vmem:[%s1165_s28 + $0x30] sm:$0xff]  ;;  %v221_v14 = vld [vmem:[%s1165_s28 + $0x40] sm:$0xff] }
  0x4a   : > { %v780_v9 = vpack.c.bf16 %v218_v6, %v217_v7  ;;  %v222_v12 = vld [vmem:[%s1165_s28 + $0x48] sm:$0xff]  ;;  %807 = vst [vmem:[%s1177_s3 + $0x8] sm:$0xff] %v775_v4   ;;  %v785_v13 = vpack.c.bf16 %v220_v10, %v219_v11  ;;  %v224_v15 = vld [vmem:[%s1165_s28 + $0x58] sm:$0xff]  ;;  %v223_v16 = vld [vmem:[%s1165_s28 + $0x50] sm:$0xff] }
  0x4b   : > { %771 = vst [vmem:[%s1177_s3] sm:$0xff] %v770_v8   ;;  %v790_v17 = vpack.c.bf16 %v222_v12, %v221_v14  ;;  %v795_v18 = vpack.c.bf16 %v224_v15, %v223_v16  ;;  %v226_v19 = vld [vmem:[%s1165_s28 + $0x68] sm:$0xff]  ;;  %v225_v20 = vld [vmem:[%s1165_s28 + $0x60] sm:$0xff]  ;;  %v228_v22 = vld [vmem:[%s1165_s28 + $0x78] sm:$0xff] }
  0x4c   : > { %808 = vst [vmem:[%s1177_s3 + $0x10] sm:$0xff] %v780_v9   ;;  %331 = vadd.xlane.f32.xlu1 %v216_v3  ;;  %327 = vadd.xlane.f32.xlu0 %v214_v5  ;;  %809 = vst [vmem:[%s1177_s3 + $0x18] sm:$0xff] %v785_v13   ;;  %v800_v21 = vpack.c.bf16 %v226_v19, %v225_v20  ;;  %v227_v23 = vld [vmem:[%s1165_s28 + $0x70] sm:$0xff]  ;;  %v309_v26 = vld [vmem:[#allocation2] sm:$0xff] }
  0x4d   : > { %810 = vst [vmem:[%s1177_s3 + $0x20] sm:$0xff] %v790_v17   ;;  %811 = vst [vmem:[%s1177_s3 + $0x28] sm:$0xff] %v795_v18   ;;  %v805_v24 = vpack.c.bf16 %v228_v22, %v227_v23  ;;  %v311_v25 = vld [vmem:[#allocation2 + $0x10] sm:$0xff]  ;;  %v312_v31 = vld [vmem:[#allocation2 + $0x18] sm:$0xff] }
  0x4e   : > { %812 = vst [vmem:[%s1177_s3 + $0x30] sm:$0xff] %v800_v21   ;;  %v310_v32 = vld [vmem:[#allocation2 + $0x8] sm:$0xff]  ;;  %v313_v38 = vld [vmem:[#allocation2 + $0x20] sm:$0xff]  ;;  %v316_v43 = vld [vmem:[#allocation2 + $0x38] sm:$0xff] }
  0x4f   : > { %813 = vst [vmem:[%s1177_s3 + $0x38] sm:$0xff] %v805_v24   ;;  %v314_v37 = vld [vmem:[#allocation2 + $0x28] sm:$0xff]  ;;  %v315_v44 = vld [vmem:[#allocation2 + $0x30] sm:$0xff]  ;;  %v317_v50 = vld [vmem:[#allocation2 + $0x40] sm:$0xff] }
  0x50   : > { %335 = vadd.xlane.f32.xlu1 %v218_v6  ;;  %333 = vadd.xlane.f32.xlu0 %v217_v7  ;;  %v318_v49 = vld [vmem:[#allocation2 + $0x48] sm:$0xff]  ;;  %v320_v55 = vld [vmem:[#allocation2 + $0x58] sm:$0xff]  ;;  %v319_v56 = vld [vmem:[#allocation2 + $0x50] sm:$0xff] }
  0x51   : > { %v322_v61 = vld [vmem:[#allocation2 + $0x68] sm:$0xff]  ;;  %v321_v62 = vld [vmem:[#allocation2 + $0x60] sm:$0xff]  ;;  %v324_v3 = vld [vmem:[#allocation2 + $0x78] sm:$0xff] }
  0x52   : > { %v323_v4 = vld [vmem:[#allocation2 + $0x70] sm:$0xff] }
  0x54   : > { %339 = vadd.xlane.f32.xlu1 %v220_v10  ;;  %337 = vadd.xlane.f32.xlu0 %v219_v11 }
  0x58   : > { %343 = vadd.xlane.f32.xlu1 %v222_v12  ;;  %341 = vadd.xlane.f32.xlu0 %v221_v14 }
  0x5c   : > { %347 = vadd.xlane.f32.xlu1 %v224_v15  ;;  %345 = vadd.xlane.f32.xlu0 %v223_v16 }
  0x60   : > { %351 = vadd.xlane.f32.xlu1 %v226_v19  ;;  %349 = vadd.xlane.f32.xlu0 %v225_v20 }
  0x64   : > { %355 = vadd.xlane.f32.xlu1 %v228_v22  ;;  %353 = vadd.xlane.f32.xlu0 %v227_v23 }
  0xd5   : > { %v330_v27 = vpop.xlane.xlu1 %329  ;;  %v326_v28 = vpop.xlane.xlu0 %325 }
  0xd6   : > { %v359_v29 = vadd.f32 %v330_v27, %v311_v25  ;;  %v357_v30 = vadd.f32 %v326_v28, %v309_v26 }
  0xd8   : > { %376 = vst.msk [vmem:[#allocation2 + $0x10] sm:$0xff] %vm373_vm1, %v359_v29  ;;  %374 = vst.msk [vmem:[#allocation2] sm:$0xff] %vm373_vm1, %v357_v30 }
  0xd9   : > { %v332_v33 = vpop.xlane.xlu1 %331  ;;  %v328_v34 = vpop.xlane.xlu0 %327 }
  0xda   : > { %v360_v35 = vadd.f32 %v332_v33, %v312_v31  ;;  %v358_v36 = vadd.f32 %v328_v34, %v310_v32 }
  0xdc   : > { %377 = vst.msk [vmem:[#allocation2 + $0x18] sm:$0xff] %vm373_vm1, %v360_v35  ;;  %375 = vst.msk [vmem:[#allocation2 + $0x8] sm:$0xff] %vm373_vm1, %v358_v36 }
  0xdd   : > { %v336_v39 = vpop.xlane.xlu1 %335  ;;  %v334_v40 = vpop.xlane.xlu0 %333 }
  0xde   : > { %v362_v41 = vadd.f32 %v336_v39, %v314_v37  ;;  %v361_v42 = vadd.f32 %v334_v40, %v313_v38 }
  0xdf   : > { %v394_v9 = vld [vmem:[#allocation2] sm:$0xff] (!%p742_p7)  ;;  %v396_v11 = vld [vmem:[#allocation2 + $0x10] sm:$0xff] (!%p742_p7) }
  0xe0   : > { %379 = vst.msk [vmem:[#allocation2 + $0x28] sm:$0xff] %vm373_vm1, %v362_v41  ;;  %378 = vst.msk [vmem:[#allocation2 + $0x20] sm:$0xff] %vm373_vm1, %v361_v42  ;;  %v426_v12 = vmax.f32 (!%p742_p7), %v394_v9, 1e-30  ;;  %v428_v14 = vmax.f32 (!%p742_p7), %v396_v11, 1e-30 }
  0xe1   : > { %v340_v45 = vpop.xlane.xlu1 %339  ;;  %v338_v46 = vpop.xlane.xlu0 %337  ;;  %vm410_vm2 = vcmp.gt.f32.partialorder (!%p742_p7), %v394_v9, 0.0  ;;  %vm412_vm4 = vcmp.gt.f32.partialorder (!%p742_p7), %v396_v11, 0.0 }
  0xe2   : > { %v364_v47 = vadd.f32 %v340_v45, %v316_v43  ;;  %v363_v48 = vadd.f32 %v338_v46, %v315_v44  ;;  %889 = vrsqrt.f32 (!%p742_p7), %v426_v12 }
  0xe3   : > { %v395_v10 = vld [vmem:[#allocation2 + $0x8] sm:$0xff] (!%p742_p7)  ;;  %v397_v15 = vld [vmem:[#allocation2 + $0x18] sm:$0xff] (!%p742_p7) }
  0xe4   : > { %381 = vst.msk [vmem:[#allocation2 + $0x38] sm:$0xff] %vm373_vm1, %v364_v47  ;;  %380 = vst.msk [vmem:[#allocation2 + $0x30] sm:$0xff] %vm373_vm1, %v363_v48  ;;  %v427_v13 = vmax.f32 (!%p742_p7), %v395_v10, 1e-30  ;;  %v429_v18 = vmax.f32 (!%p742_p7), %v397_v15, 1e-30 }
  0xe5   : > { %v344_v51 = vpop.xlane.xlu1 %343  ;;  %v342_v52 = vpop.xlane.xlu0 %341  ;;  %vm411_vm3 = vcmp.gt.f32.partialorder (!%p742_p7), %v395_v10, 0.0  ;;  %vm413_vm5 = vcmp.gt.f32.partialorder (!%p742_p7), %v397_v15, 0.0 }
  0xe6   : > { %v366_v53 = vadd.f32 %v344_v51, %v318_v49  ;;  %v365_v54 = vadd.f32 %v342_v52, %v317_v50  ;;  %891 = vrsqrt.f32 (!%p742_p7), %v427_v13 }
  0xe7   : > { %v398_v16 = vld [vmem:[#allocation2 + $0x20] sm:$0xff] (!%p742_p7)  ;;  %v1237_v17 = vld [vmem:[#allocation2 + $0x28] sm:$0xff] (!%p742_p7)  ;;  %893 = vrsqrt.f32 (!%p742_p7), %v428_v14 }
  0xe8   : > { %383 = vst.msk [vmem:[#allocation2 + $0x48] sm:$0xff] %vm373_vm1, %v366_v53  ;;  %382 = vst.msk [vmem:[#allocation2 + $0x40] sm:$0xff] %vm373_vm1, %v365_v54  ;;  %v430_v21 = vmax.f32 (!%p742_p7), %v398_v16, 1e-30  ;;  %v431_v22 = vmax.f32 (!%p742_p7), %v1237_v17, 1e-30  ;;  %895 = vrsqrt.f32 (!%p742_p7), %v429_v18 }
  0xe9   : > { %v348_v57 = vpop.xlane.xlu1 %347  ;;  %v346_v58 = vpop.xlane.xlu0 %345  ;;  %vm414_vm6 = vcmp.gt.f32.partialorder (!%p742_p7), %v398_v16, 0.0  ;;  %vm415_vm7 = vcmp.gt.f32.partialorder (!%p742_p7), %v1237_v17, 0.0 }
  0xea   : > { %v368_v59 = vadd.f32 %v348_v57, %v320_v55  ;;  %v367_v60 = vadd.f32 %v346_v58, %v319_v56  ;;  %897 = vrsqrt.f32 (!%p742_p7), %v430_v21 }
  0xeb   : > { %v1239_v19 = vld [vmem:[#allocation2 + $0x30] sm:$0xff] (!%p742_p7)  ;;  %v1241_v20 = vld [vmem:[#allocation2 + $0x38] sm:$0xff] (!%p742_p7)  ;;  %899 = vrsqrt.f32 (!%p742_p7), %v431_v22 }
  0xec   : > { %385 = vst.msk [vmem:[#allocation2 + $0x58] sm:$0xff] %vm373_vm1, %v368_v59  ;;  %384 = vst.msk [vmem:[#allocation2 + $0x50] sm:$0xff] %vm373_vm1, %v367_v60  ;;  %v432_v24 = vmax.f32 (!%p742_p7), %v1239_v19, 1e-30  ;;  %v433_v26 = vmax.f32 (!%p742_p7), %v1241_v20, 1e-30  ;;  %v890_v39 = vpop.eup (!%p742_p7), %889 }
  0xed   : > { %v352_v63 = vpop.xlane.xlu1 %351  ;;  %v350_v0 = vpop.xlane.xlu0 %349  ;;  %v458_v42 = vsel (!%p742_p7), %vm410_vm2, %v890_v39, 0.0  ;;  %vm416_vm8 = vcmp.gt.f32.partialorder (!%p742_p7), %v1239_v19, 0.0  ;;  %vm417_vm9 = vcmp.gt.f32.partialorder (!%p742_p7), %v1241_v20, 0.0 }
  0xee   : > { %v370_v1 = vadd.f32 %v352_v63, %v322_v61  ;;  %v369_v2 = vadd.f32 %v350_v0, %v321_v62  ;;  %393 = sbr.rel (%p742_p7) target bundleno = 268 (0x10c), region = 36  ;;  %901 = vrsqrt.f32 (!%p742_p7), %v432_v24  ;;  %474 = vst.msk [vmem:[%s1175_s27] sm:$0xff] (!%p742_p7), %vm373_vm1, %v458_v42 }
  0xef   : > { %v1244_v23 = vld [vmem:[#allocation2 + $0x40] sm:$0xff] (!%p742_p7)  ;;  %v1247_v25 = vld [vmem:[#allocation2 + $0x48] sm:$0xff] (!%p742_p7)  ;;  %903 = vrsqrt.f32 (!%p742_p7), %v433_v26 }
  0xf0   : > { %387 = vst.msk [vmem:[#allocation2 + $0x68] sm:$0xff] %vm373_vm1, %v370_v1  ;;  %386 = vst.msk [vmem:[#allocation2 + $0x60] sm:$0xff] %vm373_vm1, %v369_v2  ;;  %v434_v28 = vmax.f32 (!%p742_p7), %v1244_v23, 1e-30  ;;  %v435_v30 = vmax.f32 (!%p742_p7), %v1247_v25, 1e-30  ;;  %v892_v41 = vpop.eup (!%p742_p7), %891 }
  0xf1   : > { %v356_v5 = vpop.xlane.xlu1 %355  ;;  %v354_v6 = vpop.xlane.xlu0 %353  ;;  %v459_v45 = vsel (!%p742_p7), %vm411_vm3, %v892_v41, 0.0  ;;  %vm418_vm10 = vcmp.gt.f32.partialorder (!%p742_p7), %v1244_v23, 0.0  ;;  %vm419_vm11 = vcmp.gt.f32.partialorder (!%p742_p7), %v1247_v25, 0.0 }
  0xf2   : > { %v372_v7 = vadd.f32 %v356_v5, %v324_v3  ;;  %v371_v8 = vadd.f32 %v354_v6, %v323_v4  ;;  %905 = vrsqrt.f32 (!%p742_p7), %v434_v28  ;;  %v894_v44 = vpop.eup (!%p742_p7), %893  ;;  %475 = vst.msk [vmem:[%s1175_s27 + $0x8] sm:$0xff] (!%p742_p7), %vm373_vm1, %v459_v45 }
  0xf3   : > { %v1250_v27 = vld [vmem:[#allocation2 + $0x50] sm:$0xff] (!%p742_p7)  ;;  %v1253_v29 = vld [vmem:[#allocation2 + $0x58] sm:$0xff] (!%p742_p7)  ;;  %907 = vrsqrt.f32 (!%p742_p7), %v435_v30  ;;  %v896_v46 = vpop.eup (!%p742_p7), %895  ;;  %v460_v47 = vsel (!%p742_p7), %vm412_vm4, %v894_v44, 0.0 }
  0xf4   : > { %389 = vst.msk [vmem:[#allocation2 + $0x78] sm:$0xff] %vm373_vm1, %v372_v7  ;;  %388 = vst.msk [vmem:[#allocation2 + $0x70] sm:$0xff] %vm373_vm1, %v371_v8  ;;  %v436_v32 = vmax.f32 (!%p742_p7), %v1250_v27, 1e-30  ;;  %v437_v34 = vmax.f32 (!%p742_p7), %v1253_v29, 1e-30  ;;  %v898_v48 = vpop.eup (!%p742_p7), %897 }
  0xf5   : > { %476 = vst.msk [vmem:[%s1175_s27 + $0x10] sm:$0xff] %vm373_vm1, %v460_v47  ;;  %v461_v49 = vsel %vm413_vm5, %v896_v46, 0.0  ;;  %v900_v50 = vpop.eup %899  ;;  %v462_v51 = vsel %vm414_vm6, %v898_v48, 0.0  ;;  %vm420_vm12 = vcmp.gt.f32.partialorder %v1250_v27, 0.0  ;;  %vm421_vm13 = vcmp.gt.f32.partialorder %v1253_v29, 0.0 }
  0xf6   : > { %909 = vrsqrt.f32 %v436_v32  ;;  %477 = vst.msk [vmem:[%s1175_s27 + $0x18] sm:$0xff] %vm373_vm1, %v461_v49  ;;  %478 = vst.msk [vmem:[%s1175_s27 + $0x20] sm:$0xff] %vm373_vm1, %v462_v51  ;;  %v463_v53 = vsel %vm415_vm7, %v900_v50, 0.0 }
  0xf7   : > { %v1256_v31 = vld [vmem:[#allocation2 + $0x60] sm:$0xff]  ;;  %v1259_v33 = vld [vmem:[#allocation2 + $0x68] sm:$0xff]  ;;  %911 = vrsqrt.f32 %v437_v34  ;;  %479 = vst.msk [vmem:[%s1175_s27 + $0x28] sm:$0xff] %vm373_vm1, %v463_v53 }
  0xf8   : > { %v438_v36 = vmax.f32 %v1256_v31, 1e-30  ;;  %v439_v38 = vmax.f32 %v1259_v33, 1e-30  ;;  %v902_v52 = vpop.eup %901  ;;  %vm422_vm14 = vcmp.gt.f32.partialorder %v1256_v31, 0.0  ;;  %vm423_vm15 = vcmp.gt.f32.partialorder %v1259_v33, 0.0 }
  0xf9   : > { %v904_v54 = vpop.eup %903  ;;  %v464_v55 = vsel %vm416_vm8, %v902_v52, 0.0 }
  0xfa   : > { %913 = vrsqrt.f32 %v438_v36  ;;  %480 = vst.msk [vmem:[%s1175_s27 + $0x30] sm:$0xff] %vm373_vm1, %v464_v55  ;;  %v465_v57 = vsel %vm417_vm9, %v904_v54, 0.0 }
  0xfb   : > { %v1262_v35 = vld [vmem:[#allocation2 + $0x70] sm:$0xff]  ;;  %v1265_v37 = vld [vmem:[#allocation2 + $0x78] sm:$0xff]  ;;  %915 = vrsqrt.f32 %v439_v38  ;;  %481 = vst.msk [vmem:[%s1175_s27 + $0x38] sm:$0xff] %vm373_vm1, %v465_v57 }
  0xfc   : > { %v440_v40 = vmax.f32 %v1262_v35, 1e-30  ;;  %v441_v43 = vmax.f32 %v1265_v37, 1e-30  ;;  %v906_v56 = vpop.eup %905  ;;  %vm424_vm0 = vcmp.gt.f32.partialorder %v1262_v35, 0.0  ;;  %vm425_vm2 = vcmp.gt.f32.partialorder %v1265_v37, 0.0 }
  0xfd   : > { %v908_v58 = vpop.eup %907  ;;  %v466_v59 = vsel %vm418_vm10, %v906_v56, 0.0 }
  0xfe   : > { %917 = vrsqrt.f32 %v440_v40  ;;  %482 = vst.msk [vmem:[%s1175_s27 + $0x40] sm:$0xff] %vm373_vm1, %v466_v59  ;;  %v467_v61 = vsel %vm419_vm11, %v908_v58, 0.0 }
  0xff   : > { %919 = vrsqrt.f32 %v441_v43  ;;  %483 = vst.msk [vmem:[%s1175_s27 + $0x48] sm:$0xff] %vm373_vm1, %v467_v61 }
 0x100   : > { %v910_v60 = vpop.eup %909 }
 0x101   : > { %v912_v62 = vpop.eup %911  ;;  %v468_v63 = vsel %vm420_vm12, %v910_v60, 0.0 }
 0x102   : > { %484 = vst.msk [vmem:[%s1175_s27 + $0x50] sm:$0xff] %vm373_vm1, %v468_v63  ;;  %v469_v1 = vsel %vm421_vm13, %v912_v62, 0.0 }
 0x103   : > { %485 = vst.msk [vmem:[%s1175_s27 + $0x58] sm:$0xff] %vm373_vm1, %v469_v1 }
 0x104   : > { %v914_v0 = vpop.eup %913 }
 0x105   : > { %v916_v2 = vpop.eup %915  ;;  %v470_v3 = vsel %vm422_vm14, %v914_v0, 0.0 }
 0x106   : > { %486 = vst.msk [vmem:[%s1175_s27 + $0x60] sm:$0xff] %vm373_vm1, %v470_v3  ;;  %v471_v5 = vsel %vm423_vm15, %v916_v2, 0.0 }
 0x107   : > { %487 = vst.msk [vmem:[%s1175_s27 + $0x68] sm:$0xff] %vm373_vm1, %v471_v5 }
 0x108   : > { %v918_v4 = vpop.eup %917 }
 0x109   : > { %v920_v6 = vpop.eup %919  ;;  %v472_v7 = vsel %vm424_vm0, %v918_v4, 0.0 }
 0x10a   : > { %488 = vst.msk [vmem:[%s1175_s27 + $0x70] sm:$0xff] %vm373_vm1, %v472_v7  ;;  %v473_v8 = vsel %vm425_vm2, %v920_v6, 0.0 }
 0x10b   : > { %489 = vst.msk [vmem:[%s1175_s27 + $0x78] sm:$0xff] %vm373_vm1, %v473_v8 }
 0x10c PF: > { %p1368_p13 = scmp.ne.s32.totalorder %s1365_s26, 0 }
 0x10d   : > { %s766_s23 = sshll.u32 (%p1368_p13), %s1005_s13, 5  ;;  %v522_v9 = vld [vmem:[%s1177_s3] sm:$0xf] (%p1368_p13)  ;;  %v524_v10 = vld [vmem:[%s1177_s3 + $0x4] sm:$0xf] (%p1368_p13) }
 0x10e   : > { %501 = sbr.rel (!%p1368_p13) target bundleno = 281 (0x119), region = 40  ;;  %s504_s4 = sadd.s32 (%p1368_p13), %s1001_s12, %s766_s23  ;;  %v526_v11 = vld [vmem:[%s1177_s3 + $0x8] sm:$0xf] (%p1368_p13)  ;;  %v528_v12 = vld [vmem:[%s1177_s3 + $0xc] sm:$0xf] (%p1368_p13) }
 0x10f   : > { %v530_v13 = vld [vmem:[%s1177_s3 + $0x10] sm:$0xf] (%p1368_p13)  ;;  %s746_s26 = sshll.u32 (%p1368_p13), %s504_s4, 2  ;;  %v532_v14 = vld [vmem:[%s1177_s3 + $0x14] sm:$0xf] (%p1368_p13) }
 0x110   : > { %v534_v15 = vld [vmem:[%s1177_s3 + $0x18] sm:$0xf] (%p1368_p13)  ;;  %s506_s8 = scalar_lea.vmem (%p1368_p13), %s1361_s1, %s746_s26  ;;  %v536_v16 = vld [vmem:[%s1177_s3 + $0x1c] sm:$0xf] (%p1368_p13)  ;;  %v538_v17 = vld [vmem:[%s1177_s3 + $0x20] sm:$0xf] (%p1368_p13) }
 0x111   : > { %v540_v18 = vld [vmem:[%s1177_s3 + $0x24] sm:$0xf] (%p1368_p13)  ;;  %523 = vst [vmem:[%s506_s8] sm:$0xf] (%p1368_p13), %v522_v9  ;;  %525 = vst [vmem:[%s506_s8 + $0x8] sm:$0xf] (%p1368_p13), %v524_v10 }
 0x112   : > { %527 = vst [vmem:[%s506_s8 + $0x10] sm:$0xf] (%p1368_p13), %v526_v11  ;;  %529 = vst [vmem:[%s506_s8 + $0x18] sm:$0xf] (%p1368_p13), %v528_v12  ;;  %v542_v19 = vld [vmem:[%s1177_s3 + $0x28] sm:$0xf] (%p1368_p13) }
 0x113   : > { %531 = vst [vmem:[%s506_s8 + $0x20] sm:$0xf] (%p1368_p13), %v530_v13  ;;  %533 = vst [vmem:[%s506_s8 + $0x28] sm:$0xf] (%p1368_p13), %v532_v14  ;;  %v544_v20 = vld [vmem:[%s1177_s3 + $0x2c] sm:$0xf] (%p1368_p13) }
 0x114   : > { %535 = vst [vmem:[%s506_s8 + $0x30] sm:$0xf] (%p1368_p13), %v534_v15  ;;  %537 = vst [vmem:[%s506_s8 + $0x38] sm:$0xf] (%p1368_p13), %v536_v16  ;;  %v546_v21 = vld [vmem:[%s1177_s3 + $0x30] sm:$0xf] (%p1368_p13) }
 0x115   : > { %539 = vst [vmem:[%s506_s8 + $0x40] sm:$0xf] %v538_v17  ;;  %541 = vst [vmem:[%s506_s8 + $0x48] sm:$0xf] %v540_v18  ;;  %v548_v22 = vld [vmem:[%s1177_s3 + $0x34] sm:$0xf] }
 0x116   : > { %543 = vst [vmem:[%s506_s8 + $0x50] sm:$0xf] %v542_v19  ;;  %545 = vst [vmem:[%s506_s8 + $0x58] sm:$0xf] %v544_v20  ;;  %v550_v23 = vld [vmem:[%s1177_s3 + $0x38] sm:$0xf] }
 0x117   : > { %547 = vst [vmem:[%s506_s8 + $0x60] sm:$0xf] %v546_v21  ;;  %v552_v24 = vld [vmem:[%s1177_s3 + $0x3c] sm:$0xf]  ;;  %549 = vst [vmem:[%s506_s8 + $0x68] sm:$0xf] %v548_v22 }
 0x118   : > { %551 = vst [vmem:[%s506_s8 + $0x70] sm:$0xf] %v550_v23  ;;  %553 = vst [vmem:[%s506_s8 + $0x78] sm:$0xf] %v552_v24 }
 0x119 PF: > { %s16_s16 = sadd.s32 1, %s1017_s16   ;;  %s1369_s9 = smov %s993_s10 }
 0x11a   : > { %p13_p10 = scmp.ge.s32.totalorder %s16_s16, 6   ;;  %s1370_s10 = smov %s997_s11 }
 0x11b   : > { %s1371_s11 = smov %s1116_s29  ;;  %s1372_s12 = smov %s1009_s14 }
 0x11c   : > { %s1373_s13 = smov %s1013_s15  ;;  %s1374_s14 = smov %s1377_s18 }
 0x11d   : > { %s1375_s15 = smov %s1381_s19  ;;  %15 = sbr.rel (!%p13_p10) target bundleno = 5 (0x5), region = 125 }
 0x124   :  { %630 = vsyncpa [#allocation4], 1 }
 0x125   :  { %632 = vsyncpa [#allocation4 + $0x1], 1 }

// kernel: gcn_cluster_forward.3
= control target key start
LH: loop header
LB: loop body
LE: loop exit
PB: predicated region body
PF: predicated region fallthrough
CT: control target
= control target key end

     0   :  { %s1592_s15 = smov 0   ;;  %s1594_s16 = smov 0   ;;  %s2041_s0 = inlined_call_operand.vmem [shape: bf16[256,256], index: 0, kind: input, shape index: {}]   ;;  %s2042_s1 = inlined_call_operand.vmem [shape: bf16[256,128], index: 1, kind: input, shape index: {}]   ;;  %s2043_s2 = inlined_call_operand.vmem [shape: f32[256,1], index: 2, kind: input, shape index: {}]   ;;  %s2044_s3 = inlined_call_operand.vmem [shape: f32[256,128], index: 3, kind: input, shape index: {}]   ;;  %s2045_s4 = inlined_call_operand.vmem [shape: f32[256,128], index: 4, kind: output, shape index: {}]  }
   0x1   :  { %s1596_s17 = smov 0   ;;  %s1598_s18 = smov 0  }
   0x2   :  { %s1600_s19 = smov 0   ;;  %s1602_s20 = smov 0  }
   0x3   :  { %s1604_s21 = smov 0  }
   0x4 LB: > { %s23_s22 = sadd.s32 1, %s1555_s19  ;;  %s26_s23 = sadd.s32 1, %s1559_s20  ;;  %s1563_s21 = sphi %s1604_s21, %s14_s21   ;;  %s1559_s20 = sphi %s1602_s20, %s2051_s20   ;;  %s1555_s19 = sphi %s1600_s19, %s2050_s19   ;;  %s1551_s18 = sphi %s1598_s18, %s2049_s18   ;;  %s1547_s17 = sphi %s1596_s17, %s2048_s17   ;;  %s1543_s16 = sphi %s1594_s16, %s2047_s16   ;;  %s1539_s15 = sphi %s1592_s15, %s2046_s15  }
   0x5   : > { %p24_p0 = scmp.ge.s32.totalorder %s23_s22, 2  ;;  %p42_p1 = scmp.ne.s32.totalorder %s1543_s16, %s1539_s15 }
   0x6   : > { %p43_p2 = scmp.eq.s32.totalorder %s1563_s21, 0  ;;  %s35_s27 = sadd.s32 1, %s1543_s16 }
   0x7   : > { %s2053_s22 = smov (%p24_p0, %s23_s22), 0  ;;  %s2055_s23 = smov (!%p24_p0, %s26_s23), %s1559_s20 }
   0x8   : > { %p44_p3 = por %p43_p2, %p42_p1  ;;  %p28_p4 = scmp.ge.s32.totalorder %s2055_s23, 2 }
   0x9   : > { %s31_s24 = ssub.s32 %s1555_s19, %s2053_s22  ;;  %p1221_p6 = scmp.ge.s32.totalorder %s1563_s21, 4 }
   0xa   : > { %s2057_s23 = smov (%p28_p4, %s2055_s23), 0 }
   0xb   : > { %s30_s25 = ssub.s32 %s1559_s20, %s2057_s23  ;;  %170 = sbr.rel (%p1221_p6) target bundleno = 34 (0x22), region = 20 }
   0xc   : > { %s32_s26 = sor.u32 %s31_s24, %s30_s25 }
   0xd   : > { %p33_p5 = scmp.eq.s32.totalorder %s32_s26, 0 }
   0xf   : > { %s1643_s28 = scalar_select %p33_p5, %s1543_s16, %s35_s27  }
  0x12   : > { %173 = sbr.rel (!%p44_p3) target bundleno = 34 (0x22), region = 24  ;;  %s175_s29 = sand.u32 (%p44_p3), 1, %s1543_s16  }
  0x13   : > { %s1272_s30 = sshll.u32 (%p44_p3), %s1559_s20, 5  ;;  %s1222_s5 = sshll.u32 (%p44_p3), %s175_s29, 6 }
  0x14   : > { %s180_s6 = sadd.s32 (%p44_p3), %s1555_s19, %s1272_s30  ;;  %s177_s11 = scalar_lea.vmem (%p44_p3), [#allocation3], %s1222_s5 }
  0x15   : > { %s1225_s7 = sshll.u32 (%p44_p3), %s180_s6, 2 }
  0x16   : > { %s1652_s10 = scalar_lea.vmem (%p44_p3), %s2041_s0, %s1225_s7 }
  0x17   : > { %v198_v0 = vld [vmem:[%s1652_s10] sm:$0xf] (%p44_p3)  ;;  %v200_v1 = vld [vmem:[%s1652_s10 + $0x8] sm:$0xf] (%p44_p3)  ;;  %v202_v2 = vld [vmem:[%s1652_s10 + $0x10] sm:$0xf] (%p44_p3) }
  0x18   : > { %199 = vst [vmem:[%s177_s11] sm:$0xf] (%p44_p3), %v198_v0  ;;  %201 = vst [vmem:[%s177_s11 + $0x4] sm:$0xf] (%p44_p3), %v200_v1  ;;  %v204_v3 = vld [vmem:[%s1652_s10 + $0x18] sm:$0xf] (%p44_p3) }
  0x19   : > { %203 = vst [vmem:[%s177_s11 + $0x8] sm:$0xf] %v202_v2  ;;  %v206_v4 = vld [vmem:[%s1652_s10 + $0x20] sm:$0xf]  ;;  %v208_v5 = vld [vmem:[%s1652_s10 + $0x28] sm:$0xf] }
  0x1a   : > { %205 = vst [vmem:[%s177_s11 + $0xc] sm:$0xf] %v204_v3  ;;  %207 = vst [vmem:[%s177_s11 + $0x10] sm:$0xf] %v206_v4  ;;  %v210_v6 = vld [vmem:[%s1652_s10 + $0x30] sm:$0xf] }
  0x1b   : > { %209 = vst [vmem:[%s177_s11 + $0x14] sm:$0xf] %v208_v5  ;;  %v212_v7 = vld [vmem:[%s1652_s10 + $0x38] sm:$0xf]  ;;  %v214_v8 = vld [vmem:[%s1652_s10 + $0x40] sm:$0xf] }
  0x1c   : > { %211 = vst [vmem:[%s177_s11 + $0x18] sm:$0xf] %v210_v6  ;;  %213 = vst [vmem:[%s177_s11 + $0x1c] sm:$0xf] %v212_v7  ;;  %v216_v9 = vld [vmem:[%s1652_s10 + $0x48] sm:$0xf] }
  0x1d   : > { %215 = vst [vmem:[%s177_s11 + $0x20] sm:$0xf] %v214_v8  ;;  %v218_v10 = vld [vmem:[%s1652_s10 + $0x50] sm:$0xf]  ;;  %v220_v11 = vld [vmem:[%s1652_s10 + $0x58] sm:$0xf] }
  0x1e   : > { %217 = vst [vmem:[%s177_s11 + $0x24] sm:$0xf] %v216_v9  ;;  %219 = vst [vmem:[%s177_s11 + $0x28] sm:$0xf] %v218_v10  ;;  %v222_v12 = vld [vmem:[%s1652_s10 + $0x60] sm:$0xf] }
  0x1f   : > { %221 = vst [vmem:[%s177_s11 + $0x2c] sm:$0xf] %v220_v11  ;;  %v224_v13 = vld [vmem:[%s1652_s10 + $0x68] sm:$0xf]  ;;  %v226_v14 = vld [vmem:[%s1652_s10 + $0x70] sm:$0xf] }
  0x20   : > { %223 = vst [vmem:[%s177_s11 + $0x30] sm:$0xf] %v222_v12  ;;  %225 = vst [vmem:[%s177_s11 + $0x34] sm:$0xf] %v224_v13  ;;  %v228_v15 = vld [vmem:[%s1652_s10 + $0x78] sm:$0xf] }
  0x21   : > { %227 = vst [vmem:[%s177_s11 + $0x38] sm:$0xf] %v226_v14  ;;  %229 = vst [vmem:[%s177_s11 + $0x3c] sm:$0xf] %v228_v15 }
  0x22 PF: > { %p1226_p7 = scmp.ge.s32.totalorder %s1563_s21, 1  ;;  %p301_p8 = scmp.lt.s32.totalorder %s1563_s21, 5 }
  0x24   : > { %p302_p9 = pnand %p1226_p7, %p301_p8 }
  0x25   : > { %s308_s12 = sand.u32 (!%p302_p9), 1, %s1539_s15   ;;  %s1228_s13 = sshll.u32 (!%p302_p9), %s1551_s18, 4 }
  0x26   : > { %305 = sbr.rel (%p302_p9) target bundleno = 776 (0x308), region = 73  ;;  %s1227_s14 = sshll.u32 (!%p302_p9), %s308_s12, 6 }
  0x27   : > { %p345_p10 = scmp.lt.s32.totalorder (!%p302_p9), %s1228_s13, 31  ;;  %s1689_s15 = scalar_lea.vmem (!%p302_p9), [#allocation3], %s1227_s14 }
  0x28   : > { %p1234_p11 = scmp.ne.s32.totalorder (!%p302_p9), %s1547_s17, 0 }
  0x2d   : > { %s2059_s13 = smov (!%p345_p10, %s1228_s13), 31  ;;  %366 = sbr.rel (%p1234_p11) target bundleno = 55 (0x37), region = 81 }
  0x2e   : > { %s1229_s24 = sshll.u32 %s2059_s13, 3  ;;  %v1565_v16 = vmov (!%p1234_p11), 0.0  }
  0x2f   : > { %s1677_s27 = scalar_lea.vmem %s2043_s2, %s1229_s24  ;;  %s1682_s5 = scalar_lea.vmem %s2044_s3, %s1229_s24  ;;  %367 = vst [vmem:[#allocation2] sm:$0xff] (!%p1234_p11), %v1565_v16  ;;  %368 = vst [vmem:[#allocation2 + $0x8] sm:$0xff] (!%p1234_p11), %v1565_v16 }
  0x30   : > { %s1687_s8 = scalar_lea.vmem %s2045_s4, %s1229_s24  ;;  %369 = vst [vmem:[#allocation2 + $0x10] sm:$0xff] (!%p1234_p11), %v1565_v16  ;;  %370 = vst [vmem:[#allocation2 + $0x18] sm:$0xff] (!%p1234_p11), %v1565_v16 }
  0x31   : > { %371 = vst [vmem:[#allocation2 + $0x20] sm:$0xff] (!%p1234_p11), %v1565_v16  ;;  %372 = vst [vmem:[#allocation2 + $0x28] sm:$0xff] (!%p1234_p11), %v1565_v16 }
  0x32   : > { %373 = vst [vmem:[#allocation2 + $0x30] sm:$0xff] (!%p1234_p11), %v1565_v16  ;;  %374 = vst [vmem:[#allocation2 + $0x38] sm:$0xff] (!%p1234_p11), %v1565_v16 }
  0x33   : > { %375 = vst [vmem:[#allocation2 + $0x40] sm:$0xff] (!%p1234_p11), %v1565_v16  ;;  %376 = vst [vmem:[#allocation2 + $0x48] sm:$0xff] (!%p1234_p11), %v1565_v16 }
  0x34   : > { %377 = vst [vmem:[#allocation2 + $0x50] sm:$0xff] %v1565_v16  ;;  %378 = vst [vmem:[#allocation2 + $0x58] sm:$0xff] %v1565_v16 }
  0x35   : > { %379 = vst [vmem:[#allocation2 + $0x60] sm:$0xff] %v1565_v16  ;;  %380 = vst [vmem:[#allocation2 + $0x68] sm:$0xff] %v1565_v16 }
  0x36   : > { %381 = vst [vmem:[#allocation2 + $0x70] sm:$0xff] %v1565_v16  ;;  %382 = vst [vmem:[#allocation2 + $0x78] sm:$0xff] %v1565_v16 }
  0x37 PF: > { %s1235_s18 = sshll.u32 %s1547_s17, 7  ;;  %v1403_v17 = vld [vmem:[%s1689_s15] sm:$0xff]   ;;  %v1405_v27 = vld [vmem:[%s1689_s15 + $0x8] sm:$0xff]   ;;  %v1407_v29 = vld [vmem:[%s1689_s15 + $0x10] sm:$0xff]   ;;  %p1253_p12 = scmp.ne.s32.totalorder %s1547_s17, 1 }
  0x38   : > { %s384_s9 = sshra.s32 %s1235_s18, 3  ;;  %v1404_v18 = vld [vmem:[%s1689_s15 + $0x20] sm:$0xff]   ;;  %1305 = vmatprep.mubr.bf16.mxu0 %v1403_v17  ;;  %v1406_v28 = vld [vmem:[%s1689_s15 + $0x28] sm:$0xff]   ;;  %v1408_v30 = vld [vmem:[%s1689_s15 + $0x30] sm:$0xff]  }
  0x39   : > { %s1236_s10 = sshll.u32 %s384_s9, 2  ;;  %1313 = vmatprep.mubr.bf16.mxu1 %v1404_v18  ;;  %v1409_v31 = vld [vmem:[%s1689_s15 + $0x18] sm:$0xff]   ;;  %v404_v35 = vld [vmem:[#allocation2] sm:$0xff]  ;;  %v405_v45 = vld [vmem:[#allocation2 + $0x8] sm:$0xff] }
  0x3a   : > { %s1698_s13 = scalar_lea.vmem %s2042_s1, %s1236_s10  ;;  %v1410_v32 = vld [vmem:[%s1689_s15 + $0x38] sm:$0xff]   ;;  %v406_v33 = vld [vmem:[#allocation2 + $0x10] sm:$0xff]  ;;  %v665_v18 = vld [vmem:[%s1677_s27] sm:$0xff] (!%p1253_p12) }
  0x3b   : > { %v1395_v19 = vld [vmem:[%s1698_s13] sm:$0xff]   ;;  %v1396_v20 = vld [vmem:[%s1698_s13 + $0x8] sm:$0xff]   ;;  %v1397_v21 = vld [vmem:[%s1698_s13 + $0x10] sm:$0xff]  }
  0x3c   : > { %1289 = vmatprep.subr.bf16.mxu0 %v1395_v19  ;;  %1321 = vmatprep.subr.bf16.mxu1 %v1395_v19  ;;  %v1398_v22 = vld [vmem:[%s1698_s13 + $0x18] sm:$0xff]   ;;  %v1399_v23 = vld [vmem:[%s1698_s13 + $0x20] sm:$0xff]   ;;  %v1400_v24 = vld [vmem:[%s1698_s13 + $0x28] sm:$0xff]  }
  0x3d   : > { %1290 = vmatpush3.bf16.msra.mxu0 %v1395_v19  ;;  %1329 = vmatpush3.bf16.msra.mxu1 %v1395_v19  ;;  %v1401_v25 = vld [vmem:[%s1698_s13 + $0x30] sm:$0xff]   ;;  %v1402_v26 = vld [vmem:[%s1698_s13 + $0x38] sm:$0xff]   ;;  %v412_v36 = vld [vmem:[#allocation2 + $0x40] sm:$0xff]  ;;  %v1566_v19 = vmov (!%p1253_p12), 0  }
  0x3e   : > { %1291 = vmatprep.subr.bf16.mxu0 %v1396_v20  ;;  %1322 = vmatprep.subr.bf16.mxu1 %v1396_v20  ;;  %v414_v34 = vld [vmem:[#allocation2 + $0x50] sm:$0xff]  ;;  %v407_v39 = vld [vmem:[#allocation2 + $0x18] sm:$0xff]  ;;  %v413_v46 = vld [vmem:[#allocation2 + $0x48] sm:$0xff] }
  0x3f   : > { %v415_v40 = vld [vmem:[#allocation2 + $0x58] sm:$0xff]  ;;  %v410_v57 = vld [vmem:[#allocation2 + $0x30] sm:$0xff]  ;;  %v408_v59 = vld [vmem:[#allocation2 + $0x20] sm:$0xff]  ;;  %1412 = vset.pattern.permute.xlu1 (!%p1253_p12), %v1566_v19  ;;  %1411 = vset.pattern.permute.xlu0 (!%p1253_p12), %v1566_v19 }
  0x40   : > { %v418_v58 = vld [vmem:[#allocation2 + $0x70] sm:$0xff]  ;;  %v416_v60 = vld [vmem:[#allocation2 + $0x60] sm:$0xff]  ;;  %v411_v63 = vld [vmem:[#allocation2 + $0x38] sm:$0xff]  ;;  %699 = vperm.xlu0 (!%p1253_p12), %1411, %v665_v18  }
  0x41   : > { %1292 = vmatpush3.bf16.msra.mxu0 %v1396_v20  ;;  %1330 = vmatpush3.bf16.msra.mxu1 %v1396_v20  ;;  %v419_v0 = vld [vmem:[#allocation2 + $0x78] sm:$0xff]  ;;  %v409_v5 = vld [vmem:[#allocation2 + $0x28] sm:$0xff]  ;;  %v667_v17 = vld [vmem:[%s1677_s27 + $0x10] sm:$0xff] (!%p1253_p12) }
  0x42   : > { %1293 = vmatprep.subr.bf16.mxu0 %v1397_v21  ;;  %1323 = vmatprep.subr.bf16.mxu1 %v1397_v21  ;;  %v417_v6 = vld [vmem:[#allocation2 + $0x68] sm:$0xff]  ;;  %v668_v20 = vld [vmem:[%s1677_s27 + $0x18] sm:$0xff] (!%p1253_p12) }
  0x43   : > { %709 = vperm.xlu1 (!%p1253_p12), %1412, %v667_v17  }
  0x45   : > { %1294 = vmatpush3.bf16.msra.mxu0 %v1397_v21  ;;  %1331 = vmatpush3.bf16.msra.mxu1 %v1397_v21  ;;  %v666_v21 = vld [vmem:[%s1677_s27 + $0x8] sm:$0xff] (!%p1253_p12) }
  0x46   : > { %1295 = vmatprep.subr.bf16.mxu0 %v1398_v22  ;;  %1324 = vmatprep.subr.bf16.mxu1 %v1398_v22 }
  0x47   : > { %714 = vperm.xlu1 (!%p1253_p12), %1412, %v668_v20   ;;  %704 = vperm.xlu0 (!%p1253_p12), %1411, %v666_v21   ;;  %v802_v20 = vld [vmem:[%s1682_s5 + $0x48] sm:$0xff] (!%p1253_p12) }
  0x49   : > { %1296 = vmatpush3.bf16.msra.mxu0 %v1398_v22  ;;  %1332 = vmatpush3.bf16.msra.mxu1 %v1398_v22  ;;  %v670_v22 = vld [vmem:[%s1677_s27 + $0x28] sm:$0xff] (!%p1253_p12) }
  0x4a   : > { %1297 = vmatprep.subr.bf16.mxu0 %v1399_v23  ;;  %1325 = vmatprep.subr.bf16.mxu1 %v1399_v23 }
  0x4b   : > { %724 = vperm.xlu1 (!%p1253_p12), %1412, %v670_v22   ;;  %v801_v22 = vld [vmem:[%s1682_s5 + $0x40] sm:$0xff] (!%p1253_p12) }
  0x4d   : > { %1298 = vmatpush3.bf16.msra.mxu0 %v1399_v23  ;;  %1333 = vmatpush3.bf16.msra.mxu1 %v1399_v23  ;;  %v669_v23 = vld [vmem:[%s1677_s27 + $0x20] sm:$0xff] (!%p1253_p12) }
  0x4e   : > { %1299 = vmatprep.subr.bf16.mxu0 %v1400_v24  ;;  %1326 = vmatprep.subr.bf16.mxu1 %v1400_v24 }
  0x4f   : > { %719 = vperm.xlu0 (!%p1253_p12), %1411, %v669_v23  }
  0x51   : > { %1300 = vmatpush3.bf16.msra.mxu0 %v1400_v24  ;;  %1334 = vmatpush3.bf16.msra.mxu1 %v1400_v24  ;;  %v672_v24 = vld [vmem:[%s1677_s27 + $0x38] sm:$0xff] (!%p1253_p12) }
  0x52   : > { %1301 = vmatprep.subr.bf16.mxu0 %v1401_v25  ;;  %1327 = vmatprep.subr.bf16.mxu1 %v1401_v25 }
  0x53   : > { %734 = vperm.xlu1 (!%p1253_p12), %1412, %v672_v24  }
  0x55   : > { %1302 = vmatpush3.bf16.msra.mxu0 %v1401_v25  ;;  %1335 = vmatpush3.bf16.msra.mxu1 %v1401_v25  ;;  %v671_v25 = vld [vmem:[%s1677_s27 + $0x30] sm:$0xff] (!%p1253_p12) }
  0x56   : > { %1303 = vmatprep.subr.bf16.mxu0 %v1402_v26  ;;  %1328 = vmatprep.subr.bf16.mxu1 %v1402_v26 }
  0x57   : > { %729 = vperm.xlu0 (!%p1253_p12), %1411, %v671_v25  }
  0x59   : > { %1304 = vmatpush3.bf16.msra.mxu0 %v1402_v26  ;;  %1336 = vmatpush3.bf16.msra.mxu1 %v1402_v26  ;;  %v674_v26 = vld [vmem:[%s1677_s27 + $0x48] sm:$0xff] (!%p1253_p12) }
  0x5a   : > { %744 = vperm.xlu1 (!%p1253_p12), %1412, %v674_v26  }
  0x5c   : > { %1306 = vmatmul.mubr.bf16.vlgmr.msra.gmra.mrb[0].mxu0 %v1405_v27  ;;  %1314 = vmatmul.mubr.bf16.vlgmr.msra.gmra.mrb[0].mxu1 %v1406_v28  ;;  %v673_v27 = vld [vmem:[%s1677_s27 + $0x40] sm:$0xff] (!%p1253_p12)  ;;  %v676_v28 = vld [vmem:[%s1677_s27 + $0x58] sm:$0xff] (!%p1253_p12) }
  0x5d   : > { %1309 = vmatprep.mubr.bf16.mxu0 %v1407_v29  ;;  %1317 = vmatprep.mubr.bf16.mxu1 %v1408_v30  ;;  %v675_v29 = vld [vmem:[%s1677_s27 + $0x50] sm:$0xff] (!%p1253_p12)  ;;  %v678_v30 = vld [vmem:[%s1677_s27 + $0x68] sm:$0xff] (!%p1253_p12) }
  0x5e   : > { %739 = vperm.xlu0 (!%p1253_p12), %1411, %v673_v27   ;;  %754 = vperm.xlu1 (!%p1253_p12), %1412, %v676_v28  }
  0x62   : > { %749 = vperm.xlu0 (!%p1253_p12), %1411, %v675_v29   ;;  %764 = vperm.xlu1 (!%p1253_p12), %1412, %v678_v30  }
  0x64   : > { %1310 = vmatmul.mubr.bf16.gmra.mrb[4].mxu0 %v1409_v31  ;;  %1318 = vmatmul.mubr.bf16.gmra.mrb[4].mxu1 %v1410_v32  ;;  %v677_v31 = vld [vmem:[%s1677_s27 + $0x60] sm:$0xff] (!%p1253_p12)  ;;  %v680_v32 = vld [vmem:[%s1677_s27 + $0x78] sm:$0xff] (!%p1253_p12) }
  0x66   : > { %759 = vperm.xlu0 (!%p1253_p12), %1411, %v677_v31   ;;  %774 = vperm.xlu1 (!%p1253_p12), %1412, %v680_v32  }
 0x12f   : > { %v1307_v37 = vpop.f32.mrb[0].mxu0  ;;  %v1315_v38 = vpop.f32.mrb[0].mxu1 }
 0x130   : > { %v631_v41 = vadd.f32 %v1307_v37, %v406_v33  ;;  %v639_v42 = vadd.f32 %v1315_v38, %v414_v34  ;;  %v566_v43 = vpop.f32.mrb[1].mxu0  ;;  %v598_v44 = vpop.f32.mrb[1].mxu1  ;;  %v679_v33 = vld [vmem:[%s1677_s27 + $0x70] sm:$0xff] (!%p1253_p12)  ;;  %v793_v38 = vld [vmem:[%s1682_s5] sm:$0xff] (!%p1253_p12) }
 0x131   : > { %v629_v47 = vadd.f32 %v566_v43, %v404_v35  ;;  %v637_v48 = vadd.f32 %v598_v44, %v412_v36  ;;  %v1308_v49 = vpop.f32.mrb[2].mxu0  ;;  %v1316_v50 = vpop.f32.mrb[2].mxu1  ;;  %769 = vperm.xlu0 (!%p1253_p12), %1411, %v679_v33   ;;  %v795_v36 = vld [vmem:[%s1682_s5 + $0x10] sm:$0xff] (!%p1253_p12) }
 0x132   : > { %647 = vst [vmem:[#allocation2 + $0x10] sm:$0xff] %v631_v41  ;;  %655 = vst [vmem:[#allocation2 + $0x50] sm:$0xff] %v639_v42  ;;  %v632_v51 = vadd.f32 %v1308_v49, %v407_v39  ;;  %v640_v52 = vadd.f32 %v1316_v50, %v415_v40  ;;  %v569_v53 = vpop.f32.mrb[3].mxu0  ;;  %v601_v54 = vpop.f32.mrb[3].mxu1 }
 0x133   : > { %645 = vst [vmem:[#allocation2] sm:$0xff] %v629_v47  ;;  %653 = vst [vmem:[#allocation2 + $0x40] sm:$0xff] %v637_v48  ;;  %v630_v55 = vadd.f32 %v569_v53, %v405_v45  ;;  %v638_v56 = vadd.f32 %v601_v54, %v413_v46  ;;  %v710_v37 = vpop.permute.xlu1 (!%p1253_p12), %709  ;;  %v700_v39 = vpop.permute.xlu0 (!%p1253_p12), %699  ;;  %v796_v46 = vld [vmem:[%s1682_s5 + $0x18] sm:$0xff] (!%p1253_p12)  ;;  %v794_v48 = vld [vmem:[%s1682_s5 + $0x8] sm:$0xff] (!%p1253_p12) }
 0x134   : > { %648 = vst [vmem:[#allocation2 + $0x18] sm:$0xff] %v632_v51  ;;  %656 = vst [vmem:[#allocation2 + $0x58] sm:$0xff] %v640_v52 }
 0x135   : > { %646 = vst [vmem:[#allocation2 + $0x8] sm:$0xff] %v630_v55  ;;  %654 = vst [vmem:[#allocation2 + $0x48] sm:$0xff] %v638_v56 }
 0x137   : > { %v1311_v61 = vpop.f32.mrb[4].mxu0  ;;  %v1319_v62 = vpop.f32.mrb[4].mxu1  ;;  %664 = sbr.rel (%p1253_p12) target bundleno = 776 (0x308), region = 85 }
 0x138   : > { %v635_v1 = vadd.f32 %v1311_v61, %v410_v57  ;;  %v643_v2 = vadd.f32 %v1319_v62, %v418_v58  ;;  %v582_v3 = vpop.f32.mrb[5].mxu0  ;;  %v614_v4 = vpop.f32.mrb[5].mxu1  ;;  %v798_v58 = vld [vmem:[%s1682_s5 + $0x28] sm:$0xff] (!%p1253_p12) }
 0x139   : > { %v633_v7 = vadd.f32 %v582_v3, %v408_v59  ;;  %v641_v8 = vadd.f32 %v614_v4, %v416_v60  ;;  %v1312_v9 = vpop.f32.mrb[6].mxu0  ;;  %v1320_v10 = vpop.f32.mrb[6].mxu1  ;;  %v683_v34 = vld [vmem:[#allocation2 + $0x10] sm:$0xff] (!%p1253_p12)  ;;  %v797_v60 = vld [vmem:[%s1682_s5 + $0x20] sm:$0xff] (!%p1253_p12)  ;;  %v937_v4 = vlaneseq (!%p1253_p12) }
 0x13a   : > { %651 = vst [vmem:[#allocation2 + $0x30] sm:$0xff] %v635_v1  ;;  %659 = vst [vmem:[#allocation2 + $0x70] sm:$0xff] %v643_v2  ;;  %v636_v11 = vadd.f32 %v1312_v9, %v411_v63  ;;  %v644_v12 = vadd.f32 %v1320_v10, %v419_v0  ;;  %v585_v13 = vpop.f32.mrb[7].mxu0  ;;  %v617_v14 = vpop.f32.mrb[7].mxu1  ;;  %v681_v35 = vld [vmem:[#allocation2] sm:$0xff] (!%p1253_p12)  ;;  %v779_v40 = vmul.f32 (!%p1253_p12), %v710_v37, %v683_v34  ;;  %v799_v9 = vld [vmem:[%s1682_s5 + $0x30] sm:$0xff] (!%p1253_p12) }
 0x13b   : > { %649 = vst [vmem:[#allocation2 + $0x20] sm:$0xff] %v633_v7  ;;  %657 = vst [vmem:[#allocation2 + $0x60] sm:$0xff] %v641_v8  ;;  %v634_v15 = vadd.f32 %v585_v13, %v409_v5  ;;  %v642_v16 = vadd.f32 %v617_v14, %v417_v6  ;;  %v777_v41 = vmul.f32 (!%p1253_p12), %v700_v39, %v681_v35  ;;  %v684_v42 = vld [vmem:[#allocation2 + $0x18] sm:$0xff] (!%p1253_p12)  ;;  %v715_v47 = vpop.permute.xlu1 (!%p1253_p12), %714  ;;  %v705_v49 = vpop.permute.xlu0 (!%p1253_p12), %704  ;;  %v1757_v17 = vand.u32 (!%p1253_p12), 127, %v937_v4  ;;  %v691_v31 = vld [vmem:[#allocation2 + $0x50] sm:$0xff] (!%p1253_p12) }
 0x13c   : > { %652 = vst [vmem:[#allocation2 + $0x38] sm:$0xff] %v636_v11  ;;  %660 = vst [vmem:[#allocation2 + $0x78] sm:$0xff] %v644_v12  ;;  %v682_v43 = vld [vmem:[#allocation2 + $0x8] sm:$0xff] (!%p1253_p12)  ;;  %v1733_v44 = vadd.f32 (!%p1253_p12), %v795_v36, %v779_v40  ;;  %v780_v52 = vmul.f32 (!%p1253_p12), %v715_v47, %v684_v42  ;;  %v800_v7 = vld [vmem:[%s1682_s5 + $0x38] sm:$0xff] (!%p1253_p12) }
 0x13d   : > { %650 = vst [vmem:[#allocation2 + $0x28] sm:$0xff] %v634_v15  ;;  %658 = vst [vmem:[#allocation2 + $0x68] sm:$0xff] %v642_v16  ;;  %v1735_v45 = vadd.f32 (!%p1253_p12), %v793_v38, %v777_v41  ;;  %v778_v53 = vmul.f32 (!%p1253_p12), %v705_v49, %v682_v43  ;;  %v690_v15 = vld [vmem:[#allocation2 + $0x48] sm:$0xff] (!%p1253_p12)  ;;  %v689_v16 = vld [vmem:[#allocation2 + $0x40] sm:$0xff] (!%p1253_p12)  ;;  %vm939_vm0 = vcmp.lt.s32.totalorder (!%p1253_p12), %v1757_v17, 8 }
 0x13e   : > { %v845_v50 = vmul.f32 1.442695, %v1733_v44  ;;  %v1741_v56 = vadd.f32 %v796_v46, %v780_v52  ;;  %v692_v30 = vld [vmem:[#allocation2 + $0x58] sm:$0xff]  ;;  %v803_v38 = vld [vmem:[%s1682_s5 + $0x50] sm:$0xff]  ;;  %vm827_vm2 = vcmp.gt.f32.partialorder %v1733_v44, 0.0 }
 0x13f   : > { %v841_v51 = vmul.f32 1.442695, %v1735_v45  ;;  %v1743_v57 = vadd.f32 %v794_v48, %v778_v53  ;;  %v725_v59 = vpop.permute.xlu1 %724  ;;  %v720_v61 = vpop.permute.xlu0 %719  ;;  %v804_v36 = vld [vmem:[%s1682_s5 + $0x58] sm:$0xff]  ;;  %vm825_vm1 = vcmp.gt.f32.partialorder %v1735_v45, 0.0 }
 0x140   : > { %1413 = vpow2.f32 %v845_v50  ;;  %v847_v62 = vmul.f32 1.442695, %v1741_v56  ;;  %vm828_vm4 = vcmp.gt.f32.partialorder %v1741_v56, 0.0 }
 0x141   : > { %1415 = vpow2.f32 %v841_v51  ;;  %v843_v63 = vmul.f32 1.442695, %v1743_v57  ;;  %v687_v3 = vld [vmem:[#allocation2 + $0x30] sm:$0xff]  ;;  %vm826_vm3 = vcmp.gt.f32.partialorder %v1743_v57, 0.0 }
 0x142   : > { %v685_v55 = vld [vmem:[#allocation2 + $0x20] sm:$0xff]  ;;  %1417 = vpow2.f32 %v847_v62 }
 0x143   : > { %v781_v1 = vmul.f32 %v720_v61, %v685_v55  ;;  %v688_v2 = vld [vmem:[#allocation2 + $0x38] sm:$0xff]  ;;  %1419 = vpow2.f32 %v843_v63  ;;  %v735_v8 = vpop.permute.xlu1 %734  ;;  %v730_v10 = vpop.permute.xlu0 %729  ;;  %v693_v50 = vld [vmem:[#allocation2 + $0x60] sm:$0xff] }
 0x144   : > { %v686_v54 = vld [vmem:[#allocation2 + $0x28] sm:$0xff]  ;;  %v784_v13 = vmul.f32 %v735_v8, %v688_v2  ;;  %v783_v14 = vmul.f32 %v730_v10, %v687_v3  ;;  %v695_v8 = vld [vmem:[#allocation2 + $0x70] sm:$0xff] }
 0x145   : > { %v782_v0 = vmul.f32 %v725_v59, %v686_v54  ;;  %v1751_v6 = vadd.f32 %v797_v60, %v781_v1  ;;  %v694_v48 = vld [vmem:[#allocation2 + $0x68] sm:$0xff]  ;;  %v805_v60 = vld [vmem:[%s1682_s5 + $0x60] sm:$0xff] }
 0x146   : > { %v1759_v18 = vadd.f32 %v800_v7, %v784_v13  ;;  %v1761_v19 = vadd.f32 %v799_v9, %v783_v14  ;;  %v696_v7 = vld [vmem:[#allocation2 + $0x78] sm:$0xff] }
 0x147   : > { %v1749_v5 = vadd.f32 %v798_v58, %v782_v0  ;;  %v849_v12 = vmul.f32 1.442695, %v1751_v6  ;;  %v745_v21 = vpop.permute.xlu1 %744  ;;  %v740_v23 = vpop.permute.xlu0 %739  ;;  %vm829_vm5 = vcmp.gt.f32.partialorder %v1751_v6, 0.0  ;;  %v806_v58 = vld [vmem:[%s1682_s5 + $0x68] sm:$0xff] }
 0x148   : > { %v855_v25 = vmul.f32 1.442695, %v1759_v18  ;;  %v853_v26 = vmul.f32 1.442695, %v1761_v19  ;;  %v786_v27 = vmul.f32 %v745_v21, %v690_v15  ;;  %v785_v28 = vmul.f32 %v740_v23, %v689_v16 }
 0x149   : > { %v851_v11 = vmul.f32 1.442695, %v1749_v5  ;;  %vm830_vm6 = vcmp.gt.f32.partialorder %v1749_v5, 0.0  ;;  %vm831_vm7 = vcmp.gt.f32.partialorder %v1761_v19, 0.0  ;;  %vm832_vm8 = vcmp.gt.f32.partialorder %v1759_v18, 0.0 }
 0x14a   : > { %v1414_v24 = vpop.eup %1413  ;;  %v1768_v33 = vadd.f32 %v802_v20, %v786_v27  ;;  %v1770_v34 = vadd.f32 %v801_v22, %v785_v28  ;;  %v808_v20 = vld [vmem:[%s1682_s5 + $0x78] sm:$0xff]  ;;  %v807_v22 = vld [vmem:[%s1682_s5 + $0x70] sm:$0xff] }
 0x14b   : > { %1421 = vpow2.f32 %v851_v11  ;;  %v1416_v29 = vpop.eup %1415  ;;  %v1256_v32 = vadd.f32 -1.0, %v1414_v24  ;;  %v755_v37 = vpop.permute.xlu1 %754 }
 0x14c   : > { %1423 = vpow2.f32 %v849_v12  ;;  %v1254_v35 = vadd.f32 -1.0, %v1416_v29  ;;  %v750_v39 = vpop.permute.xlu0 %749  ;;  %v1418_v41 = vpop.eup %1417  ;;  %v859_v42 = vmul.f32 1.442695, %v1768_v33  ;;  %v857_v43 = vmul.f32 1.442695, %v1770_v34 }
 0x14d   : > { %1425 = vpow2.f32 %v855_v25  ;;  %v891_v40 = vmul.f32 1.6732632, %v1256_v32  ;;  %v788_v46 = vmul.f32 %v755_v37, %v692_v30  ;;  %v787_v47 = vmul.f32 %v750_v39, %v691_v31  ;;  %v1420_v49 = vpop.eup %1419 }
 0x14e   : > { %1427 = vpow2.f32 %v853_v26  ;;  %v889_v51 = vmul.f32 1.6732632, %v1254_v35  ;;  %v1257_v52 = vadd.f32 -1.0, %v1418_v41  ;;  %v1255_v63 = vadd.f32 -1.0, %v1420_v49 }
 0x14f   : > { %1429 = vpow2.f32 %v859_v42  ;;  %v1780_v53 = vadd.f32 %v804_v36, %v788_v46  ;;  %v1782_v54 = vadd.f32 %v803_v38, %v787_v47  ;;  %v907_v55 = vsel %vm827_vm2, %v1733_v44, %v891_v40  ;;  %v765_v59 = vpop.permute.xlu1 %764 }
 0x150   : > { %1431 = vpow2.f32 %v857_v43  ;;  %v760_v61 = vpop.permute.xlu0 %759  ;;  %v905_v62 = vsel %vm825_vm1, %v1735_v45, %v889_v51  ;;  %v892_v0 = vmul.f32 1.6732632, %v1257_v52  ;;  %v790_v4 = vmul.f32 %v765_v59, %v694_v48 }
 0x151   : > { %v863_v2 = vmul.f32 1.442695, %v1780_v53  ;;  %v861_v3 = vmul.f32 1.442695, %v1782_v54  ;;  %v789_v44 = vmul.f32 %v760_v61, %v693_v50  ;;  %v921_v10 = vmul.f32 1.050701, %v905_v62 }
 0x152   : > { %v923_v11 = vmul.f32 1.050701, %v907_v55  ;;  %v890_v12 = vmul.f32 1.6732632, %v1255_v63  ;;  %v908_v45 = vsel %vm828_vm4, %v1741_v56, %v892_v0  ;;  %v1799_v13 = vadd.f32 %v806_v58, %v790_v4 }
 0x153   : > { %1433 = vpow2.f32 %v863_v2  ;;  %v1801_v14 = vadd.f32 %v805_v60, %v789_v44  ;;  %v924_v15 = vmul.f32 1.050701, %v908_v45  ;;  %v1806_v16 = vsel %vm939_vm0, %v921_v10, -inf  ;;  %v775_v21 = vpop.permute.xlu1 %774 }
 0x154   : > { %1435 = vpow2.f32 %v861_v3  ;;  %v906_v56 = vsel %vm826_vm3, %v1743_v57, %v890_v12  ;;  %v867_v26 = vmul.f32 1.442695, %v1799_v13  ;;  %956 = vmax.xlane.f32.xlu0 %v1806_v16  ;;  %v792_v28 = vmul.f32 %v775_v21, %v696_v7 }
 0x155   : > { %v1422_v1 = vpop.eup %1421  ;;  %v865_v27 = vmul.f32 1.442695, %v1801_v14  ;;  %v1818_v31 = vsel %vm939_vm0, %v923_v11, -inf  ;;  %v922_v32 = vmul.f32 1.050701, %v906_v56  ;;  %v1837_v49 = vsel %vm939_vm0, %v924_v15, -inf }
 0x156   : > { %v1424_v9 = vpop.eup %1423  ;;  %v1259_v36 = vadd.f32 -1.0, %v1422_v1  ;;  %1437 = vpow2.f32 %v867_v26  ;;  %v1820_v57 = vadd.f32 %v808_v20, %v792_v28  ;;  %vm833_vm9 = vcmp.gt.f32.partialorder %v1770_v34, 0.0 }
 0x157   : > { %v1258_v24 = vadd.f32 -1.0, %v1424_v9  ;;  %v1426_v25 = vpop.eup %1425  ;;  %1439 = vpow2.f32 %v865_v27  ;;  %v1826_v39 = vsel %vm939_vm0, %v922_v32, -inf  ;;  %vm834_vm10 = vcmp.gt.f32.partialorder %v1768_v33, 0.0 }
 0x158   : > { %v1428_v30 = vpop.eup %1427  ;;  %v894_v41 = vmul.f32 1.6732632, %v1259_v36  ;;  %v871_v43 = vmul.f32 1.442695, %v1820_v57  ;;  %960 = vmax.xlane.f32.xlu0 %v1818_v31  ;;  %958 = vmax.xlane.f32.xlu1 %v1826_v39  ;;  %v1261_v51 = vadd.f32 -1.0, %v1426_v25  ;;  %vm835_vm11 = vcmp.gt.f32.partialorder %v1782_v54, 0.0 }
 0x159   : > { %v893_v35 = vmul.f32 1.6732632, %v1258_v24  ;;  %v1260_v38 = vadd.f32 -1.0, %v1428_v30  ;;  %v1430_v42 = vpop.eup %1429  ;;  %vm836_vm12 = vcmp.gt.f32.partialorder %v1780_v53, 0.0  ;;  %vm837_vm13 = vcmp.gt.f32.partialorder %v1801_v14, 0.0 }
 0x15a   : > { %v1432_v48 = vpop.eup %1431  ;;  %1441 = vpow2.f32 %v871_v43  ;;  %v896_v60 = vmul.f32 1.6732632, %v1261_v51  ;;  %v1263_v61 = vadd.f32 -1.0, %v1430_v42  ;;  %vm838_vm14 = vcmp.gt.f32.partialorder %v1799_v13, 0.0 }
 0x15b   : > { %v909_v40 = vsel %vm829_vm5, %v1751_v6, %v893_v35  ;;  %v910_v6 = vsel %vm830_vm6, %v1749_v5, %v894_v41  ;;  %v895_v50 = vmul.f32 1.6732632, %v1260_v38  ;;  %v1262_v58 = vadd.f32 -1.0, %v1432_v48 }
 0x15c   : > { %v925_v47 = vmul.f32 1.050701, %v909_v40  ;;  %v926_v55 = vmul.f32 1.050701, %v910_v6  ;;  %962 = vmax.xlane.f32.xlu0 %v1837_v49  ;;  %v912_v1 = vsel %vm832_vm8, %v1759_v18, %v896_v60  ;;  %v898_v2 = vmul.f32 1.6732632, %v1263_v61 }
 0x15d   : > { %v911_v59 = vsel %vm831_vm7, %v1761_v19, %v895_v50  ;;  %v1434_v62 = vpop.eup %1433  ;;  %v897_v63 = vmul.f32 1.6732632, %v1262_v58  ;;  %vm840_vm1 = vcmp.gt.f32.partialorder %v1820_v57, 0.0 }
 0x15e   : > { %v1844_v52 = vsel %vm939_vm0, %v925_v47, -inf  ;;  %v927_v5 = vmul.f32 1.050701, %v911_v59  ;;  %v1436_v0 = vpop.eup %1435  ;;  %v1265_v3 = vadd.f32 -1.0, %v1434_v62  ;;  %v1861_v7 = vsel %vm939_vm0, %v926_v55, -inf }
 0x15f   : > { %964 = vmax.xlane.f32.xlu1 %v1844_v52  ;;  %v913_v4 = vsel %vm833_vm9, %v1770_v34, %v897_v63  ;;  %v1264_v44 = vadd.f32 -1.0, %v1436_v0  ;;  %v914_v10 = vsel %vm834_vm10, %v1768_v33, %v898_v2 }
 0x160   : > { %v1856_v19 = vsel %vm939_vm0, %v927_v5, -inf  ;;  %v929_v9 = vmul.f32 1.050701, %v913_v4  ;;  %v1438_v18 = vpop.eup %1437  ;;  %966 = vmax.xlane.f32.xlu0 %v1861_v7  ;;  %v900_v12 = vmul.f32 1.6732632, %v1265_v3 }
 0x161   : > { %v899_v11 = vmul.f32 1.6732632, %v1264_v44  ;;  %v1440_v45 = vpop.eup %1439  ;;  %v1267_v15 = vadd.f32 -1.0, %v1438_v18 }
 0x162   : > { %v1869_v34 = vsel %vm939_vm0, %v929_v9, -inf  ;;  %v1266_v21 = vadd.f32 -1.0, %v1440_v45  ;;  %v916_v24 = vsel %vm836_vm12, %v1780_v53, %v900_v12 }
 0x163   : > { %968 = vmax.xlane.f32.xlu1 %v1856_v19  ;;  %v915_v20 = vsel %vm835_vm11, %v1782_v54, %v899_v11  ;;  %v902_v26 = vmul.f32 1.6732632, %v1267_v15  ;;  %v932_v35 = vmul.f32 1.050701, %v916_v24 }
 0x164   : > { %v931_v56 = vmul.f32 1.050701, %v915_v20  ;;  %v1442_v33 = vpop.eup %1441  ;;  %v901_v25 = vmul.f32 1.6732632, %v1266_v21 }
 0x165   : > { %v1269_v28 = vadd.f32 -1.0, %v1442_v33  ;;  %v918_v53 = vsel %vm838_vm14, %v1799_v13, %v902_v26  ;;  %v1903_v42 = vsel %vm939_vm0, %v932_v35, -inf }
 0x166   : > { %v1883_v54 = vsel %vm939_vm0, %v931_v56, -inf  ;;  %v934_v43 = vmul.f32 1.050701, %v918_v53 }
 0x167   : > { %972 = vmax.xlane.f32.xlu1 %v1869_v34  ;;  %v904_v40 = vmul.f32 1.6732632, %v1269_v28 }
 0x169   : > { %v920_v13 = vsel %vm840_vm1, %v1820_v57, %v904_v40 }
 0x16a   : > { %v936_v48 = vmul.f32 1.050701, %v920_v13 }
 0x16b   : > { %976 = vmax.xlane.f32.xlu1 %v1883_v54 }
 0x16c   : > { %v1921_v6 = vsel %vm939_vm0, %v936_v48, -inf }
 0x1b0   : > { %v770_v23 = vpop.permute.xlu0 %769 }
 0x1b1   : > { %v791_v29 = vmul.f32 %v770_v23, %v695_v8  ;;  %v928_v8 = vmul.f32 1.050701, %v912_v1  ;;  %v930_v23 = vmul.f32 1.050701, %v914_v10 }
 0x1b3   : > { %v1822_v37 = vadd.f32 %v807_v22, %v791_v29  ;;  %v1875_v22 = vsel %vm939_vm0, %v928_v8, -inf  ;;  %v917_v29 = vsel %vm837_vm13, %v1801_v14, %v901_v25  ;;  %v1889_v32 = vsel %vm939_vm0, %v930_v23, -inf }
 0x1b4   : > { %970 = vmax.xlane.f32.xlu0 %v1875_v22  ;;  %v933_v36 = vmul.f32 1.050701, %v917_v29 }
 0x1b5   : > { %v869_v46 = vmul.f32 1.442695, %v1822_v37  ;;  %vm839_vm15 = vcmp.gt.f32.partialorder %v1822_v37, 0.0 }
 0x1b6   : > { %v1897_v14 = vsel %vm939_vm0, %v933_v36, -inf }
 0x1b7   : > { %1443 = vpow2.f32 %v869_v46  ;;  %980 = vmax.xlane.f32.xlu1 %v1897_v14 }
 0x1b8   : > { %974 = vmax.xlane.f32.xlu0 %v1889_v32 }
 0x1bc   : > { %978 = vmax.xlane.f32.xlu0 %v1903_v42 }
 0x1c1   : > { %v1444_v27 = vpop.eup %1443 }
 0x1c2   : > { %v1268_v30 = vadd.f32 -1.0, %v1444_v27 }
 0x1c4   : > { %v903_v38 = vmul.f32 1.6732632, %v1268_v30 }
 0x1c6   : > { %v919_v41 = vsel %vm839_vm15, %v1822_v37, %v903_v38  ;;  %v1915_v37 = vsel %vm939_vm0, %v934_v43, -inf }
 0x1c7   : > { %v935_v46 = vmul.f32 1.050701, %v919_v41  ;;  %982 = vmax.xlane.f32.xlu0 %v1915_v37 }
 0x1c9   : > { %v1911_v47 = vsel %vm939_vm0, %v935_v46, -inf }
 0x1ca   : > { %984 = vmax.xlane.f32.xlu1 %v1911_v47 }
 0x1cb   : > { %986 = vmax.xlane.f32.xlu0 %v1921_v6 }
 0x1e1   : > { %v957_v57 = vpop.xlane.xlu0 %956 }
 0x1e2   : > { %v988_v50 = vsub.f32 %v1806_v16, %v957_v57 }
 0x1e4   : > { %v1004_v51 = vmul.f32 1.442695, %v988_v50 }
 0x1e5   : > { %v959_v55 = vpop.xlane.xlu1 %958  ;;  %v961_v58 = vpop.xlane.xlu0 %960 }
 0x1e6   : > { %1445 = vpow2.f32 %v1004_v51  ;;  %v989_v59 = vsub.f32 %v1826_v39, %v959_v55  ;;  %v990_v60 = vsub.f32 %v1818_v31, %v961_v58 }
 0x1e8   : > { %v1006_v61 = vmul.f32 1.442695, %v989_v59  ;;  %v1008_v62 = vmul.f32 1.442695, %v990_v60 }
 0x1e9   : > { %v963_v63 = vpop.xlane.xlu0 %962 }
 0x1ea   : > { %1447 = vpow2.f32 %v1006_v61  ;;  %v991_v0 = vsub.f32 %v1837_v49, %v963_v63 }
 0x1eb   : > { %1449 = vpow2.f32 %v1008_v62 }
 0x1ec   : > { %v965_v5 = vpop.xlane.xlu1 %964  ;;  %v1010_v16 = vmul.f32 1.442695, %v991_v0 }
 0x1ed   : > { %v992_v17 = vsub.f32 %v1844_v52, %v965_v5  ;;  %v967_v3 = vpop.xlane.xlu0 %966 }
 0x1ee   : > { %v993_v39 = vsub.f32 %v1861_v7, %v967_v3 }
 0x1ef   : > { %v1012_v1 = vmul.f32 1.442695, %v992_v17 }
 0x1f0   : > { %v969_v2 = vpop.xlane.xlu1 %968  ;;  %v1931_v31 = vpop.eup %1445  ;;  %v1014_v8 = vmul.f32 1.442695, %v993_v39 }
 0x1f1   : > { %1451 = vpow2.f32 %v1012_v1  ;;  %v994_v4 = vsub.f32 %v1856_v19, %v969_v2  ;;  %1036 = vadd.xlane.f32.xlu1 %v1931_v31 }
 0x1f2   : > { %1453 = vpow2.f32 %v1010_v16 }
 0x1f3   : > { %v1016_v44 = vmul.f32 1.442695, %v994_v4 }
 0x1f4   : > { %v973_v9 = vpop.xlane.xlu1 %972  ;;  %v1936_v10 = vpop.eup %1447 }
 0x1f5   : > { %1455 = vpow2.f32 %v1016_v44  ;;  %v996_v49 = vsub.f32 %v1869_v34, %v973_v9  ;;  %v1938_v7 = vpop.eup %1449  ;;  %1038 = vadd.xlane.f32.xlu0 %v1936_v10 }
 0x1f6   : > { %1457 = vpow2.f32 %v1014_v8  ;;  %1040 = vadd.xlane.f32.xlu1 %v1938_v7 }
 0x1f7   : > { %v1020_v19 = vmul.f32 1.442695, %v996_v49 }
 0x1f8   : > { %v977_v12 = vpop.xlane.xlu1 %976 }
 0x1f9   : > { %1459 = vpow2.f32 %v1020_v19  ;;  %v998_v15 = vsub.f32 %v1883_v54, %v977_v12 }
 0x1fb   : > { %v1944_v20 = vpop.eup %1451  ;;  %v1024_v21 = vmul.f32 1.442695, %v998_v15 }
 0x1fc   : > { %v1946_v23 = vpop.eup %1453  ;;  %1044 = vadd.xlane.f32.xlu1 %v1944_v20 }
 0x1fd   : > { %1042 = vadd.xlane.f32.xlu0 %v1946_v23 }
 0x1ff   : > { %v1952_v26 = vpop.eup %1455 }
 0x200   : > { %v1954_v28 = vpop.eup %1457  ;;  %1048 = vadd.xlane.f32.xlu1 %v1952_v26 }
 0x201   : > { %1046 = vadd.xlane.f32.xlu0 %v1954_v28 }
 0x203   : > { %v1960_v36 = vpop.eup %1459 }
 0x204   : > { %1052 = vadd.xlane.f32.xlu1 %v1960_v36 }
 0x241   : > { %v971_v52 = vpop.xlane.xlu0 %970 }
 0x242   : > { %v995_v18 = vsub.f32 %v1875_v22, %v971_v52 }
 0x244   : > { %v1018_v11 = vmul.f32 1.442695, %v995_v18  ;;  %v981_v56 = vpop.xlane.xlu1 %980 }
 0x245   : > { %v975_v45 = vpop.xlane.xlu0 %974  ;;  %v1000_v24 = vsub.f32 %v1897_v14, %v981_v56 }
 0x246   : > { %v997_v34 = vsub.f32 %v1889_v32, %v975_v45  ;;  %1461 = vpow2.f32 %v1018_v11 }
 0x247   : > { %1463 = vpow2.f32 %v1024_v21  ;;  %v1028_v27 = vmul.f32 1.442695, %v1000_v24 }
 0x248   : > { %v1022_v22 = vmul.f32 1.442695, %v997_v34 }
 0x249   : > { %v979_v33 = vpop.xlane.xlu0 %978 }
 0x24a   : > { %v999_v25 = vsub.f32 %v1903_v42, %v979_v33  ;;  %1465 = vpow2.f32 %v1022_v22 }
 0x24b   : > { %1467 = vpow2.f32 %v1028_v27 }
 0x24c   : > { %v1026_v54 = vmul.f32 1.442695, %v999_v25 }
 0x24e   : > { %1469 = vpow2.f32 %v1026_v54 }
 0x250   : > { %v1962_v40 = vpop.eup %1461 }
 0x251   : > { %1050 = vadd.xlane.f32.xlu0 %v1962_v40  ;;  %v1967_v42 = vpop.eup %1463 }
 0x252   : > { %1056 = vadd.xlane.f32.xlu1 %v1967_v42 }
 0x254   : > { %v983_v30 = vpop.xlane.xlu0 %982  ;;  %v1969_v46 = vpop.eup %1465 }
 0x255   : > { %v1001_v35 = vsub.f32 %v1915_v37, %v983_v30  ;;  %1054 = vadd.xlane.f32.xlu0 %v1969_v46  ;;  %v1973_v13 = vpop.eup %1467 }
 0x256   : > { %1060 = vadd.xlane.f32.xlu1 %v1973_v13 }
 0x257   : > { %v985_v29 = vpop.xlane.xlu1 %984  ;;  %v1030_v38 = vmul.f32 1.442695, %v1001_v35 }
 0x258   : > { %v1002_v32 = vsub.f32 %v1911_v47, %v985_v29  ;;  %v987_v14 = vpop.xlane.xlu0 %986  ;;  %v1975_v47 = vpop.eup %1469 }
 0x259   : > { %v1003_v41 = vsub.f32 %v1921_v6, %v987_v14  ;;  %1058 = vadd.xlane.f32.xlu0 %v1975_v47 }
 0x25a   : > { %v1032_v53 = vmul.f32 1.442695, %v1002_v32 }
 0x25b   : > { %v1034_v43 = vmul.f32 1.442695, %v1003_v41 }
 0x25c   : > { %1471 = vpow2.f32 %v1032_v53 }
 0x25d   : > { %1473 = vpow2.f32 %v1030_v38 }
 0x25e   : > { %1475 = vpow2.f32 %v1034_v43 }
 0x266   : > { %v1979_v37 = vpop.eup %1471 }
 0x267   : > { %v1981_v48 = vpop.eup %1473  ;;  %1064 = vadd.xlane.f32.xlu1 %v1979_v37 }
 0x268   : > { %1062 = vadd.xlane.f32.xlu0 %v1981_v48  ;;  %v1985_v6 = vpop.eup %1475 }
 0x26c   : > { %1066 = vadd.xlane.f32.xlu0 %v1985_v6 }
 0x27e   : > { %v1037_v57 = vpop.xlane.xlu1 %1036 }
 0x27f   : > { %1477 = vrcp.f32 %v1037_v57 }
 0x282   : > { %v1039_v50 = vpop.xlane.xlu0 %1038 }
 0x283   : > { %v1041_v51 = vpop.xlane.xlu1 %1040  ;;  %1479 = vrcp.f32 %v1039_v50 }
 0x284   : > { %1481 = vrcp.f32 %v1041_v51 }
 0x289   : > { %v1045_v55 = vpop.xlane.xlu1 %1044  ;;  %v1478_v59 = vpop.eup %1477 }
 0x28a   : > { %v1043_v58 = vpop.xlane.xlu0 %1042  ;;  %1483 = vrcp.f32 %v1045_v55  ;;  %v1069_v60 = vmul.f32 %v1478_v59, %v1931_v31 }
 0x28b   : > { %1485 = vrcp.f32 %v1043_v58 }
 0x28c   : > { %1100 = vst [vmem:[%s1687_s8] sm:$0xff] %v1069_v60 }
 0x28d   : > { %v1049_v61 = vpop.xlane.xlu1 %1048  ;;  %v1480_v5 = vpop.eup %1479 }
 0x28e   : > { %v1047_v62 = vpop.xlane.xlu0 %1046  ;;  %1487 = vrcp.f32 %v1049_v61  ;;  %v1482_v63 = vpop.eup %1481  ;;  %v1071_v17 = vmul.f32 %v1480_v5, %v1936_v10 }
 0x28f   : > { %1489 = vrcp.f32 %v1047_v62  ;;  %v1073_v0 = vmul.f32 %v1482_v63, %v1938_v7 }
 0x290   : > { %1101 = vst [vmem:[%s1687_s8 + $0x8] sm:$0xff] %v1071_v17 }
 0x291   : > { %v1053_v1 = vpop.xlane.xlu1 %1052  ;;  %1102 = vst [vmem:[%s1687_s8 + $0x10] sm:$0xff] %v1073_v0 }
 0x292   : > { %1491 = vrcp.f32 %v1053_v1 }
 0x294   : > { %v1484_v2 = vpop.eup %1483 }
 0x295   : > { %v1486_v3 = vpop.eup %1485  ;;  %v1077_v4 = vmul.f32 %v1484_v2, %v1944_v20 }
 0x296   : > { %v1075_v44 = vmul.f32 %v1486_v3, %v1946_v23 }
 0x297   : > { %1104 = vst [vmem:[%s1687_s8 + $0x20] sm:$0xff] %v1077_v4 }
 0x298   : > { %v1488_v8 = vpop.eup %1487  ;;  %1103 = vst [vmem:[%s1687_s8 + $0x18] sm:$0xff] %v1075_v44 }
 0x299   : > { %v1490_v9 = vpop.eup %1489  ;;  %v1081_v52 = vmul.f32 %v1488_v8, %v1952_v26 }
 0x29a   : > { %v1079_v10 = vmul.f32 %v1490_v9, %v1954_v28 }
 0x29b   : > { %1106 = vst [vmem:[%s1687_s8 + $0x30] sm:$0xff] %v1081_v52 }
 0x29c   : > { %v1492_v19 = vpop.eup %1491  ;;  %1105 = vst [vmem:[%s1687_s8 + $0x28] sm:$0xff] %v1079_v10 }
 0x29d   : > { %v1085_v7 = vmul.f32 %v1492_v19, %v1960_v36 }
 0x29f   : > { %1108 = vst [vmem:[%s1687_s8 + $0x40] sm:$0xff] %v1085_v7 }
 0x2de   : > { %v1051_v16 = vpop.xlane.xlu0 %1050 }
 0x2df   : > { %1493 = vrcp.f32 %v1051_v16  ;;  %v1057_v39 = vpop.xlane.xlu1 %1056 }
 0x2e0   : > { %1495 = vrcp.f32 %v1057_v39 }
 0x2e2   : > { %v1055_v31 = vpop.xlane.xlu0 %1054 }
 0x2e3   : > { %1497 = vrcp.f32 %v1055_v31  ;;  %v1061_v49 = vpop.xlane.xlu1 %1060 }
 0x2e4   : > { %1499 = vrcp.f32 %v1061_v49 }
 0x2e6   : > { %v1059_v18 = vpop.xlane.xlu0 %1058 }
 0x2e7   : > { %1501 = vrcp.f32 %v1059_v18 }
 0x2e9   : > { %v1494_v11 = vpop.eup %1493 }
 0x2ea   : > { %v1083_v15 = vmul.f32 %v1494_v11, %v1962_v40  ;;  %v1496_v34 = vpop.eup %1495 }
 0x2eb   : > { %v1089_v21 = vmul.f32 %v1496_v34, %v1967_v42 }
 0x2ec   : > { %1107 = vst [vmem:[%s1687_s8 + $0x38] sm:$0xff] %v1083_v15 }
 0x2ed   : > { %v1498_v20 = vpop.eup %1497  ;;  %1110 = vst [vmem:[%s1687_s8 + $0x50] sm:$0xff] %v1089_v21 }
 0x2ee   : > { %v1087_v23 = vmul.f32 %v1498_v20, %v1969_v46  ;;  %v1500_v56 = vpop.eup %1499 }
 0x2ef   : > { %v1093_v24 = vmul.f32 %v1500_v56, %v1973_v13 }
 0x2f0   : > { %1109 = vst [vmem:[%s1687_s8 + $0x48] sm:$0xff] %v1087_v23 }
 0x2f1   : > { %v1502_v33 = vpop.eup %1501  ;;  %1112 = vst [vmem:[%s1687_s8 + $0x60] sm:$0xff] %v1093_v24 }
 0x2f2   : > { %v1091_v25 = vmul.f32 %v1502_v33, %v1975_v47 }
 0x2f4   : > { %v1065_v12 = vpop.xlane.xlu1 %1064  ;;  %1111 = vst [vmem:[%s1687_s8 + $0x58] sm:$0xff] %v1091_v25 }
 0x2f5   : > { %v1063_v45 = vpop.xlane.xlu0 %1062  ;;  %1503 = vrcp.f32 %v1065_v12 }
 0x2f6   : > { %1505 = vrcp.f32 %v1063_v45 }
 0x2f9   : > { %v1067_v22 = vpop.xlane.xlu0 %1066 }
 0x2fa   : > { %1507 = vrcp.f32 %v1067_v22 }
 0x2ff   : > { %v1504_v26 = vpop.eup %1503 }
 0x300   : > { %v1506_v27 = vpop.eup %1505  ;;  %v1097_v54 = vmul.f32 %v1504_v26, %v1979_v37 }
 0x301   : > { %v1095_v28 = vmul.f32 %v1506_v27, %v1981_v48 }
 0x302   : > { %1114 = vst [vmem:[%s1687_s8 + $0x70] sm:$0xff] %v1097_v54 }
 0x303   : > { %1113 = vst [vmem:[%s1687_s8 + $0x68] sm:$0xff] %v1095_v28 }
 0x304   : > { %v1508_v29 = vpop.eup %1507 }
 0x305   : > { %v1099_v30 = vmul.f32 %v1508_v29, %v1985_v6 }
 0x307   : > { %1115 = vst [vmem:[%s1687_s8 + $0x78] sm:$0xff] %v1099_v30 }
 0x308 PF: > { %s14_s21 = sadd.s32 1, %s1563_s21   ;;  %s2046_s15 = smov %s1543_s16 }
 0x309   : > { %p11_p13 = scmp.ge.s32.totalorder %s14_s21, 6   ;;  %s2047_s16 = smov %s1643_s28 }
 0x30a   : > { %s2048_s17 = smov %s1555_s19  ;;  %s2049_s18 = smov %s1559_s20 }
 0x30b   : > { %s2050_s19 = smov %s2053_s22  ;;  %s2051_s20 = smov %s2057_s23 }
 0x30c   :  { %13 = sbr.rel (!%p11_p13) target bundleno = 4 (0x4), region = 127 }

</bundles_post_ra>
